<compile_context>
chip_gen: v6e
topology: v6e:2x2x1
jax: 0.10.0
libtpu: 0.0.40
codegen_flags: <defaults>
</compile_context>

<pallas_src>
import functools

import jax
import jax.numpy as jnp
from jax.experimental import pallas as pl
from jax.experimental.pallas import tpu as pltpu


def gru_kernel(x_ref, wih_ref, whh_ref, bgi_ref, bhn_ref, w2_ref, b2_ref,
               out_ref, h_all_ref, *, seq_len, batch, hidden):
    """Full GRU + ReLU + Linear in one kernel invocation (padded, lane-dense layout).

    x_ref    : (S*B, Ip)    all inputs, time-major rows (t*B + b)
    wih_ref  : (Ip, 3Hp)    input->hidden weights, gate order [r, z, n]
    whh_ref  : (Hp, 3Hp)    hidden->hidden weights, gate order [r, z, n]
    bgi_ref  : (1, 3Hp)     b_ih with b_hh's r/z columns folded in
    bhn_ref  : (1, Hp)      hidden-side n-gate bias (stays inside r*(...))
    w2_ref   : (Hp, Op)     output linear weight
    b2_ref   : (1, Op)      output linear bias
    out_ref  : (S*B, Op)    outputs, same row layout as x_ref
    h_all_ref: (S*B, Hp)    VMEM scratch holding every timestep's hidden state
    """
    H = hidden
    B = batch

    # Input-side gate pre-activations for ALL timesteps in one MXU pass.
    # b_ih (+ b_hh's r/z columns) folded in here once.
    gi_all = (jnp.dot(x_ref[...], wih_ref[...],
                      preferred_element_type=jnp.float32)
              + bgi_ref[...])                              # (S*B, 3Hp)

    whh = whh_ref[...]                                     # (Hp, 3Hp) hoisted
    bhn = jnp.broadcast_to(bhn_ref[...], (B, H))           # (B, Hp)   hoisted broadcast

    h = jnp.zeros((B, H), jnp.float32)
    for t in range(seq_len):                               # static unroll (S is small)
        gi = gi_all[t * B:(t + 1) * B, :]                  # 8-aligned static slice
        # Single fused hidden-side matmul per step (one MXU pass, K = Hp = 128).
        gh = jnp.dot(h, whh, preferred_element_type=jnp.float32)
        r = jax.nn.sigmoid(gi[:, :H] + gh[:, :H])
        z = jax.nn.sigmoid(gi[:, H:2 * H] + gh[:, H:2 * H])
        n = jnp.tanh(gi[:, 2 * H:] + r * (gh[:, 2 * H:] + bhn))
        h = (1.0 - z) * n + z * h
        h_all_ref[t * B:(t + 1) * B, :] = h                # per-step store (vst slot)

    # ReLU + output projection outside the recurrence: one matmul, one lane-dense store.
    a = jnp.maximum(h_all_ref[...], 0.0)                   # (S*B, Hp)
    y = (jnp.dot(a, w2_ref[...], preferred_element_type=jnp.float32)
         + b2_ref[...])                                    # (S*B, Op)
    out_ref[...] = y.astype(out_ref.dtype)


def _round_up(v, m):
    return ((v + m - 1) // m) * m


def _pad_gate_cols(w, H, Hp):
    """Pad each of the 3 gate column-blocks of w (rows, 3H) -> (rows, 3Hp) with zeros."""
    r, z, n = w[:, :H], w[:, H:2 * H], w[:, 2 * H:]
    pad = lambda a: jnp.pad(a, ((0, 0), (0, Hp - H)))
    return jnp.concatenate([pad(r), pad(z), pad(n)], axis=1)


@jax.jit
def gru_forward(x, w_ih, w_hh, b_ih, b_hh, w2, b2):
    """x: (S, B, I) f32.  Returns (S, B, O) f32.

    Weights are in the concatenated-gate layout:
      w_ih (I, 3H), w_hh (H, 3H), b_ih (1, 3H), b_hh (1, 3H) with gate order [r, z, n]
      (i.e. PyTorch weight_ih_l0 / weight_hh_l0 transposed), w2 (H, O), b2 (1, O).
    """
    S, B, I = x.shape
    H = w_hh.shape[0]
    O = w2.shape[1]

    # Lane/sublane-dense padded sizes.
    Bp = _round_up(B, 8)       # sublanes
    Ip = _round_up(I, 128)     # lanes (input projection K)
    Hp = _round_up(H, 128)     # lanes (gate width / hidden matmul K)
    Op = _round_up(O, 128)     # lanes (output store width)

    # --- input padding (batch sublanes + input lanes), zeros so results unchanged ---
    x = jnp.pad(x, ((0, 0), (0, Bp - B), (0, Ip - I)))
    x2d = x.reshape(S * Bp, Ip)

    # --- weight / bias padding (all padded entries exactly zero) ---
    w_ih_p = _pad_gate_cols(jnp.pad(w_ih, ((0, Ip - I), (0, 0))), H, Hp)  # (Ip, 3Hp)
    w_hh_p = _pad_gate_cols(jnp.pad(w_hh, ((0, Hp - H), (0, 0))), H, Hp)  # (Hp, 3Hp)
    b_ih_p = _pad_gate_cols(b_ih, H, Hp)                                  # (1, 3Hp)
    b_hh_p = _pad_gate_cols(b_hh, H, Hp)                                  # (1, 3Hp)

    # Fold b_hh's r/z columns into the input-side bias; keep only b_hn for the loop.
    b_gi = jnp.concatenate(
        [b_ih_p[:, :2 * Hp] + b_hh_p[:, :2 * Hp], b_ih_p[:, 2 * Hp:]], axis=1)
    b_hn = b_hh_p[:, 2 * Hp:]                                             # (1, Hp)

    w2_p = jnp.pad(w2, ((0, Hp - H), (0, Op - O)))                        # (Hp, Op)
    b2_p = jnp.pad(b2, ((0, 0), (0, Op - O)))                             # (1, Op)

    kernel = functools.partial(gru_kernel, seq_len=S, batch=Bp, hidden=Hp)

    out2d = pl.pallas_call(
        kernel,
        out_shape=jax.ShapeDtypeStruct((S * Bp, Op), x.dtype),
        in_specs=[pl.BlockSpec(memory_space=pltpu.MemorySpace.VMEM)] * 7,
        out_specs=pl.BlockSpec(memory_space=pltpu.MemorySpace.VMEM),
        scratch_shapes=[pltpu.VMEM((S * Bp, Hp), jnp.float32)],
    )(x2d, w_ih_p, w_hh_p, b_gi, b_hn, w2_p, b2_p)

    out = out2d.reshape(S, Bp, Op)
    return out[:, :B, :O]


def gru_reference(x, w_ih, w_hh, b_ih, b_hh, w2, b2):
    """Pure-JAX reference matching torch.nn.GRU -> ReLU -> Linear."""
    S, B, I = x.shape
    H = w_hh.shape[0]

    def step(h, x_t):
        gi = x_t @ w_ih + b_ih
        gh = h @ w_hh + b_hh
        r = jax.nn.sigmoid(gi[:, :H] + gh[:, :H])
        z = jax.nn.sigmoid(gi[:, H:2 * H] + gh[:, H:2 * H])
        n = jnp.tanh(gi[:, 2 * H:] + r * gh[:, 2 * H:])
        h_new = (1.0 - z) * n + z * h
        return h_new, h_new

    h0 = jnp.zeros((B, H), jnp.float32)
    _, hs = jax.lax.scan(step, h0, x)
    return jnp.maximum(hs, 0.0) @ w2 + b2


if __name__ == "__main__":
    # Small shapes consistent with the module defaults.
    SEQ, BATCH = 8, 4
    INPUT_SIZE = 102     # nn.GRU default input_size
    HIDDEN = 64          # hidden_size1 default
    OUTPUT_SIZE = 16

    key = jax.random.PRNGKey(0)
    ks = jax.random.split(key, 8)
    bound = 1.0 / jnp.sqrt(HIDDEN)

    x = jax.random.normal(ks[0], (SEQ, BATCH, INPUT_SIZE), jnp.float32)

    # Concatenated gate layout [r, z, n] (PyTorch weight_*_l0 transposed).
    w_ih = jax.random.uniform(ks[1], (INPUT_SIZE, 3 * HIDDEN), jnp.float32,
                              -bound, bound)
    w_hh = jax.random.uniform(ks[2], (HIDDEN, 3 * HIDDEN), jnp.float32,
                              -bound, bound)
    b_ih = jax.random.uniform(ks[3], (1, 3 * HIDDEN), jnp.float32, -bound, bound)
    b_hh = jax.random.uniform(ks[4], (1, 3 * HIDDEN), jnp.float32, -bound, bound)
    w2 = jax.random.uniform(ks[5], (HIDDEN, OUTPUT_SIZE), jnp.float32,
                            -bound, bound)
    b2 = jax.random.uniform(ks[6], (1, OUTPUT_SIZE), jnp.float32,
                            -bound, bound)

    out = gru_forward(x, w_ih, w_hh, b_ih, b_hh, w2, b2)
    out = jax.block_until_ready(out)

    ref = gru_reference(x, w_ih, w_hh, b_ih, b_hh, w2, b2)
    assert out.shape == (SEQ, BATCH, OUTPUT_SIZE)
    assert jnp.allclose(out, ref, atol=1e-4, rtol=1e-4), (
        f"max abs err {jnp.max(jnp.abs(out - ref))}")

    print("KERNEL_OK")
</pallas_src>

<mosaic_0001>
module attributes {stable_mosaic.version = 11 : i64} {
  func.func @gru_kernel(%arg0: memref<64x128xf32, #tpu.memory_space<vmem>>, %arg1: memref<128x384xf32, #tpu.memory_space<vmem>>, %arg2: memref<128x384xf32, #tpu.memory_space<vmem>>, %arg3: memref<1x384xf32, #tpu.memory_space<vmem>>, %arg4: memref<1x128xf32, #tpu.memory_space<vmem>>, %arg5: memref<128x128xf32, #tpu.memory_space<vmem>>, %arg6: memref<1x128xf32, #tpu.memory_space<vmem>>, %arg7: memref<64x128xf32, #tpu.memory_space<vmem>>, %arg8: memref<64x128xf32, #tpu.memory_space<vmem>>) attributes {dimension_semantics = [], scalar_prefetch = 0 : i64, scratch_operands = 1 : i64, tpu.core_type = #tpu.core_type<tc>} {
    %c0 = arith.constant 0 : index
    %c0_0 = arith.constant 0 : index
    %0 = vector.load %arg0[%c0, %c0_0] : memref<64x128xf32, #tpu.memory_space<vmem>>, vector<64x128xf32>
    %c0_1 = arith.constant 0 : index
    %c0_2 = arith.constant 0 : index
    %1 = vector.load %arg1[%c0_1, %c0_2] : memref<128x384xf32, #tpu.memory_space<vmem>>, vector<128x384xf32>
    %cst = arith.constant dense<0.000000e+00> : vector<64x384xf32>
    %2 = tpu.matmul %0, %1, %cst {dimension_numbers = #tpu.dot_dimension_numbers<[1], [0], [0], [1], [0, 0, 1, 1], [], []>} : vector<64x128xf32>, vector<128x384xf32>, vector<64x384xf32> -> vector<64x384xf32>
    %c0_3 = arith.constant 0 : index
    %c0_4 = arith.constant 0 : index
    %3 = vector.load %arg3[%c0_3, %c0_4] : memref<1x384xf32, #tpu.memory_space<vmem>>, vector<1x384xf32>
    %4 = vector.broadcast %3 : vector<1x384xf32> to vector<64x384xf32>
    %5 = arith.addf %2, %4 : vector<64x384xf32>
    %c0_5 = arith.constant 0 : index
    %c0_6 = arith.constant 0 : index
    %6 = vector.load %arg2[%c0_5, %c0_6] : memref<128x384xf32, #tpu.memory_space<vmem>>, vector<128x384xf32>
    %c0_7 = arith.constant 0 : index
    %c0_8 = arith.constant 0 : index
    %7 = vector.load %arg4[%c0_7, %c0_8] : memref<1x128xf32, #tpu.memory_space<vmem>>, vector<1x128xf32>
    %8 = vector.shape_cast %7 : vector<1x128xf32> to vector<1x128xf32>
    %9 = vector.broadcast %8 : vector<1x128xf32> to vector<8x128xf32>
    %cst_9 = arith.constant 0.000000e+00 : f32
    %10 = vector.broadcast %cst_9 : f32 to vector<8x128xf32>
    %11 = vector.extract_strided_slice %5 {offsets = [0, 0], sizes = [8, 384], strides = [1, 1]} : vector<64x384xf32> to vector<8x384xf32>
    %cst_10 = arith.constant dense<0.000000e+00> : vector<8x384xf32>
    %12 = tpu.matmul %10, %6, %cst_10 {dimension_numbers = #tpu.dot_dimension_numbers<[1], [0], [0], [1], [0, 0, 1, 1], [], []>} : vector<8x128xf32>, vector<128x384xf32>, vector<8x384xf32> -> vector<8x384xf32>
    %13 = vector.extract_strided_slice %11 {offsets = [0, 0], sizes = [8, 128], strides = [1, 1]} : vector<8x384xf32> to vector<8x128xf32>
    %14 = vector.extract_strided_slice %12 {offsets = [0, 0], sizes = [8, 128], strides = [1, 1]} : vector<8x384xf32> to vector<8x128xf32>
    %15 = arith.addf %13, %14 : vector<8x128xf32>
    %16 = arith.negf %15 : vector<8x128xf32>
    %17 = math.exp %16 : vector<8x128xf32>
    %cst_11 = arith.constant 1.000000e+00 : f32
    %18 = vector.broadcast %cst_11 : f32 to vector<8x128xf32>
    %19 = arith.addf %18, %17 : vector<8x128xf32>
    %20 = arith.divf %18, %19 : vector<8x128xf32>
    %21 = vector.extract_strided_slice %11 {offsets = [0, 128], sizes = [8, 128], strides = [1, 1]} : vector<8x384xf32> to vector<8x128xf32>
    %22 = vector.extract_strided_slice %12 {offsets = [0, 128], sizes = [8, 128], strides = [1, 1]} : vector<8x384xf32> to vector<8x128xf32>
    %23 = arith.addf %21, %22 : vector<8x128xf32>
    %24 = arith.negf %23 : vector<8x128xf32>
    %25 = math.exp %24 : vector<8x128xf32>
    %cst_12 = arith.constant 1.000000e+00 : f32
    %26 = vector.broadcast %cst_12 : f32 to vector<8x128xf32>
    %27 = arith.addf %26, %25 : vector<8x128xf32>
    %28 = arith.divf %26, %27 : vector<8x128xf32>
    %29 = vector.extract_strided_slice %11 {offsets = [0, 256], sizes = [8, 128], strides = [1, 1]} : vector<8x384xf32> to vector<8x128xf32>
    %30 = vector.extract_strided_slice %12 {offsets = [0, 256], sizes = [8, 128], strides = [1, 1]} : vector<8x384xf32> to vector<8x128xf32>
    %31 = arith.addf %30, %9 : vector<8x128xf32>
    %32 = arith.mulf %20, %31 : vector<8x128xf32>
    %33 = arith.addf %29, %32 : vector<8x128xf32>
    %34 = math.tanh %33 : vector<8x128xf32>
    %cst_13 = arith.constant 1.000000e+00 : f32
    %35 = vector.broadcast %cst_13 : f32 to vector<8x128xf32>
    %36 = arith.subf %35, %28 : vector<8x128xf32>
    %37 = arith.mulf %36, %34 : vector<8x128xf32>
    %38 = arith.mulf %28, %10 : vector<8x128xf32>
    %39 = arith.addf %37, %38 : vector<8x128xf32>
    %c0_14 = arith.constant 0 : index
    %c0_15 = arith.constant 0 : index
    %40 = vector.load %arg8[%c0_14, %c0_15] : memref<64x128xf32, #tpu.memory_space<vmem>>, vector<8x128xf32>
    tpu.vector_store %arg8[%c0_14, %c0_15], %39 {strides = array<i32>} : memref<64x128xf32, #tpu.memory_space<vmem>>, vector<8x128xf32>,
    %41 = vector.extract_strided_slice %5 {offsets = [8, 0], sizes = [8, 384], strides = [1, 1]} : vector<64x384xf32> to vector<8x384xf32>
    %cst_16 = arith.constant dense<0.000000e+00> : vector<8x384xf32>
    %42 = tpu.matmul %39, %6, %cst_16 {dimension_numbers = #tpu.dot_dimension_numbers<[1], [0], [0], [1], [0, 0, 1, 1], [], []>} : vector<8x128xf32>, vector<128x384xf32>, vector<8x384xf32> -> vector<8x384xf32>
    %43 = vector.extract_strided_slice %41 {offsets = [0, 0], sizes = [8, 128], strides = [1, 1]} : vector<8x384xf32> to vector<8x128xf32>
    %44 = vector.extract_strided_slice %42 {offsets = [0, 0], sizes = [8, 128], strides = [1, 1]} : vector<8x384xf32> to vector<8x128xf32>
    %45 = arith.addf %43, %44 : vector<8x128xf32>
    %46 = arith.negf %45 : vector<8x128xf32>
    %47 = math.exp %46 : vector<8x128xf32>
    %cst_17 = arith.constant 1.000000e+00 : f32
    %48 = vector.broadcast %cst_17 : f32 to vector<8x128xf32>
    %49 = arith.addf %48, %47 : vector<8x128xf32>
    %50 = arith.divf %48, %49 : vector<8x128xf32>
    %51 = vector.extract_strided_slice %41 {offsets = [0, 128], sizes = [8, 128], strides = [1, 1]} : vector<8x384xf32> to vector<8x128xf32>
    %52 = vector.extract_strided_slice %42 {offsets = [0, 128], sizes = [8, 128], strides = [1, 1]} : vector<8x384xf32> to vector<8x128xf32>
    %53 = arith.addf %51, %52 : vector<8x128xf32>
    %54 = arith.negf %53 : vector<8x128xf32>
    %55 = math.exp %54 : vector<8x128xf32>
    %cst_18 = arith.constant 1.000000e+00 : f32
    %56 = vector.broadcast %cst_18 : f32 to vector<8x128xf32>
    %57 = arith.addf %56, %55 : vector<8x128xf32>
    %58 = arith.divf %56, %57 : vector<8x128xf32>
    %59 = vector.extract_strided_slice %41 {offsets = [0, 256], sizes = [8, 128], strides = [1, 1]} : vector<8x384xf32> to vector<8x128xf32>
    %60 = vector.extract_strided_slice %42 {offsets = [0, 256], sizes = [8, 128], strides = [1, 1]} : vector<8x384xf32> to vector<8x128xf32>
    %61 = arith.addf %60, %9 : vector<8x128xf32>
    %62 = arith.mulf %50, %61 : vector<8x128xf32>
    %63 = arith.addf %59, %62 : vector<8x128xf32>
    %64 = math.tanh %63 : vector<8x128xf32>
    %cst_19 = arith.constant 1.000000e+00 : f32
    %65 = vector.broadcast %cst_19 : f32 to vector<8x128xf32>
    %66 = arith.subf %65, %58 : vector<8x128xf32>
    %67 = arith.mulf %66, %64 : vector<8x128xf32>
    %68 = arith.mulf %58, %39 : vector<8x128xf32>
    %69 = arith.addf %67, %68 : vector<8x128xf32>
    %c8 = arith.constant 8 : index
    %c0_20 = arith.constant 0 : index
    %70 = vector.load %arg8[%c8, %c0_20] : memref<64x128xf32, #tpu.memory_space<vmem>>, vector<8x128xf32>
    tpu.vector_store %arg8[%c8, %c0_20], %69 {strides = array<i32>} : memref<64x128xf32, #tpu.memory_space<vmem>>, vector<8x128xf32>,
    %71 = vector.extract_strided_slice %5 {offsets = [16, 0], sizes = [8, 384], strides = [1, 1]} : vector<64x384xf32> to vector<8x384xf32>
    %cst_21 = arith.constant dense<0.000000e+00> : vector<8x384xf32>
    %72 = tpu.matmul %69, %6, %cst_21 {dimension_numbers = #tpu.dot_dimension_numbers<[1], [0], [0], [1], [0, 0, 1, 1], [], []>} : vector<8x128xf32>, vector<128x384xf32>, vector<8x384xf32> -> vector<8x384xf32>
    %73 = vector.extract_strided_slice %71 {offsets = [0, 0], sizes = [8, 128], strides = [1, 1]} : vector<8x384xf32> to vector<8x128xf32>
    %74 = vector.extract_strided_slice %72 {offsets = [0, 0], sizes = [8, 128], strides = [1, 1]} : vector<8x384xf32> to vector<8x128xf32>
    %75 = arith.addf %73, %74 : vector<8x128xf32>
    %76 = arith.negf %75 : vector<8x128xf32>
    %77 = math.exp %76 : vector<8x128xf32>
    %cst_22 = arith.constant 1.000000e+00 : f32
    %78 = vector.broadcast %cst_22 : f32 to vector<8x128xf32>
    %79 = arith.addf %78, %77 : vector<8x128xf32>
    %80 = arith.divf %78, %79 : vector<8x128xf32>
    %81 = vector.extract_strided_slice %71 {offsets = [0, 128], sizes = [8, 128], strides = [1, 1]} : vector<8x384xf32> to vector<8x128xf32>
    %82 = vector.extract_strided_slice %72 {offsets = [0, 128], sizes = [8, 128], strides = [1, 1]} : vector<8x384xf32> to vector<8x128xf32>
    %83 = arith.addf %81, %82 : vector<8x128xf32>
    %84 = arith.negf %83 : vector<8x128xf32>
    %85 = math.exp %84 : vector<8x128xf32>
    %cst_23 = arith.constant 1.000000e+00 : f32
    %86 = vector.broadcast %cst_23 : f32 to vector<8x128xf32>
    %87 = arith.addf %86, %85 : vector<8x128xf32>
    %88 = arith.divf %86, %87 : vector<8x128xf32>
    %89 = vector.extract_strided_slice %71 {offsets = [0, 256], sizes = [8, 128], strides = [1, 1]} : vector<8x384xf32> to vector<8x128xf32>
    %90 = vector.extract_strided_slice %72 {offsets = [0, 256], sizes = [8, 128], strides = [1, 1]} : vector<8x384xf32> to vector<8x128xf32>
    %91 = arith.addf %90, %9 : vector<8x128xf32>
    %92 = arith.mulf %80, %91 : vector<8x128xf32>
    %93 = arith.addf %89, %92 : vector<8x128xf32>
    %94 = math.tanh %93 : vector<8x128xf32>
    %cst_24 = arith.constant 1.000000e+00 : f32
    %95 = vector.broadcast %cst_24 : f32 to vector<8x128xf32>
    %96 = arith.subf %95, %88 : vector<8x128xf32>
    %97 = arith.mulf %96, %94 : vector<8x128xf32>
    %98 = arith.mulf %88, %69 : vector<8x128xf32>
    %99 = arith.addf %97, %98 : vector<8x128xf32>
    %c16 = arith.constant 16 : index
    %c0_25 = arith.constant 0 : index
    %100 = vector.load %arg8[%c16, %c0_25] : memref<64x128xf32, #tpu.memory_space<vmem>>, vector<8x128xf32>
    tpu.vector_store %arg8[%c16, %c0_25], %99 {strides = array<i32>} : memref<64x128xf32, #tpu.memory_space<vmem>>, vector<8x128xf32>,
    %101 = vector.extract_strided_slice %5 {offsets = [24, 0], sizes = [8, 384], strides = [1, 1]} : vector<64x384xf32> to vector<8x384xf32>
    %cst_26 = arith.constant dense<0.000000e+00> : vector<8x384xf32>
    %102 = tpu.matmul %99, %6, %cst_26 {dimension_numbers = #tpu.dot_dimension_numbers<[1], [0], [0], [1], [0, 0, 1, 1], [], []>} : vector<8x128xf32>, vector<128x384xf32>, vector<8x384xf32> -> vector<8x384xf32>
    %103 = vector.extract_strided_slice %101 {offsets = [0, 0], sizes = [8, 128], strides = [1, 1]} : vector<8x384xf32> to vector<8x128xf32>
    %104 = vector.extract_strided_slice %102 {offsets = [0, 0], sizes = [8, 128], strides = [1, 1]} : vector<8x384xf32> to vector<8x128xf32>
    %105 = arith.addf %103, %104 : vector<8x128xf32>
    %106 = arith.negf %105 : vector<8x128xf32>
    %107 = math.exp %106 : vector<8x128xf32>
    %cst_27 = arith.constant 1.000000e+00 : f32
    %108 = vector.broadcast %cst_27 : f32 to vector<8x128xf32>
    %109 = arith.addf %108, %107 : vector<8x128xf32>
    %110 = arith.divf %108, %109 : vector<8x128xf32>
    %111 = vector.extract_strided_slice %101 {offsets = [0, 128], sizes = [8, 128], strides = [1, 1]} : vector<8x384xf32> to vector<8x128xf32>
    %112 = vector.extract_strided_slice %102 {offsets = [0, 128], sizes = [8, 128], strides = [1, 1]} : vector<8x384xf32> to vector<8x128xf32>
    %113 = arith.addf %111, %112 : vector<8x128xf32>
    %114 = arith.negf %113 : vector<8x128xf32>
    %115 = math.exp %114 : vector<8x128xf32>
    %cst_28 = arith.constant 1.000000e+00 : f32
    %116 = vector.broadcast %cst_28 : f32 to vector<8x128xf32>
    %117 = arith.addf %116, %115 : vector<8x128xf32>
    %118 = arith.divf %116, %117 : vector<8x128xf32>
    %119 = vector.extract_strided_slice %101 {offsets = [0, 256], sizes = [8, 128], strides = [1, 1]} : vector<8x384xf32> to vector<8x128xf32>
    %120 = vector.extract_strided_slice %102 {offsets = [0, 256], sizes = [8, 128], strides = [1, 1]} : vector<8x384xf32> to vector<8x128xf32>
    %121 = arith.addf %120, %9 : vector<8x128xf32>
    %122 = arith.mulf %110, %121 : vector<8x128xf32>
    %123 = arith.addf %119, %122 : vector<8x128xf32>
    %124 = math.tanh %123 : vector<8x128xf32>
    %cst_29 = arith.constant 1.000000e+00 : f32
    %125 = vector.broadcast %cst_29 : f32 to vector<8x128xf32>
    %126 = arith.subf %125, %118 : vector<8x128xf32>
    %127 = arith.mulf %126, %124 : vector<8x128xf32>
    %128 = arith.mulf %118, %99 : vector<8x128xf32>
    %129 = arith.addf %127, %128 : vector<8x128xf32>
    %c24 = arith.constant 24 : index
    %c0_30 = arith.constant 0 : index
    %130 = vector.load %arg8[%c24, %c0_30] : memref<64x128xf32, #tpu.memory_space<vmem>>, vector<8x128xf32>
    tpu.vector_store %arg8[%c24, %c0_30], %129 {strides = array<i32>} : memref<64x128xf32, #tpu.memory_space<vmem>>, vector<8x128xf32>,
    %131 = vector.extract_strided_slice %5 {offsets = [32, 0], sizes = [8, 384], strides = [1, 1]} : vector<64x384xf32> to vector<8x384xf32>
    %cst_31 = arith.constant dense<0.000000e+00> : vector<8x384xf32>
    %132 = tpu.matmul %129, %6, %cst_31 {dimension_numbers = #tpu.dot_dimension_numbers<[1], [0], [0], [1], [0, 0, 1, 1], [], []>} : vector<8x128xf32>, vector<128x384xf32>, vector<8x384xf32> -> vector<8x384xf32>
    %133 = vector.extract_strided_slice %131 {offsets = [0, 0], sizes = [8, 128], strides = [1, 1]} : vector<8x384xf32> to vector<8x128xf32>
    %134 = vector.extract_strided_slice %132 {offsets = [0, 0], sizes = [8, 128], strides = [1, 1]} : vector<8x384xf32> to vector<8x128xf32>
    %135 = arith.addf %133, %134 : vector<8x128xf32>
    %136 = arith.negf %135 : vector<8x128xf32>
    %137 = math.exp %136 : vector<8x128xf32>
    %cst_32 = arith.constant 1.000000e+00 : f32
    %138 = vector.broadcast %cst_32 : f32 to vector<8x128xf32>
    %139 = arith.addf %138, %137 : vector<8x128xf32>
    %140 = arith.divf %138, %139 : vector<8x128xf32>
    %141 = vector.extract_strided_slice %131 {offsets = [0, 128], sizes = [8, 128], strides = [1, 1]} : vector<8x384xf32> to vector<8x128xf32>
    %142 = vector.extract_strided_slice %132 {offsets = [0, 128], sizes = [8, 128], strides = [1, 1]} : vector<8x384xf32> to vector<8x128xf32>
    %143 = arith.addf %141, %142 : vector<8x128xf32>
    %144 = arith.negf %143 : vector<8x128xf32>
    %145 = math.exp %144 : vector<8x128xf32>
    %cst_33 = arith.constant 1.000000e+00 : f32
    %146 = vector.broadcast %cst_33 : f32 to vector<8x128xf32>
    %147 = arith.addf %146, %145 : vector<8x128xf32>
    %148 = arith.divf %146, %147 : vector<8x128xf32>
    %149 = vector.extract_strided_slice %131 {offsets = [0, 256], sizes = [8, 128], strides = [1, 1]} : vector<8x384xf32> to vector<8x128xf32>
    %150 = vector.extract_strided_slice %132 {offsets = [0, 256], sizes = [8, 128], strides = [1, 1]} : vector<8x384xf32> to vector<8x128xf32>
    %151 = arith.addf %150, %9 : vector<8x128xf32>
    %152 = arith.mulf %140, %151 : vector<8x128xf32>
    %153 = arith.addf %149, %152 : vector<8x128xf32>
    %154 = math.tanh %153 : vector<8x128xf32>
    %cst_34 = arith.constant 1.000000e+00 : f32
    %155 = vector.broadcast %cst_34 : f32 to vector<8x128xf32>
    %156 = arith.subf %155, %148 : vector<8x128xf32>
    %157 = arith.mulf %156, %154 : vector<8x128xf32>
    %158 = arith.mulf %148, %129 : vector<8x128xf32>
    %159 = arith.addf %157, %158 : vector<8x128xf32>
    %c32 = arith.constant 32 : index
    %c0_35 = arith.constant 0 : index
    %160 = vector.load %arg8[%c32, %c0_35] : memref<64x128xf32, #tpu.memory_space<vmem>>, vector<8x128xf32>
    tpu.vector_store %arg8[%c32, %c0_35], %159 {strides = array<i32>} : memref<64x128xf32, #tpu.memory_space<vmem>>, vector<8x128xf32>,
    %161 = vector.extract_strided_slice %5 {offsets = [40, 0], sizes = [8, 384], strides = [1, 1]} : vector<64x384xf32> to vector<8x384xf32>
    %cst_36 = arith.constant dense<0.000000e+00> : vector<8x384xf32>
    %162 = tpu.matmul %159, %6, %cst_36 {dimension_numbers = #tpu.dot_dimension_numbers<[1], [0], [0], [1], [0, 0, 1, 1], [], []>} : vector<8x128xf32>, vector<128x384xf32>, vector<8x384xf32> -> vector<8x384xf32>
    %163 = vector.extract_strided_slice %161 {offsets = [0, 0], sizes = [8, 128], strides = [1, 1]} : vector<8x384xf32> to vector<8x128xf32>
    %164 = vector.extract_strided_slice %162 {offsets = [0, 0], sizes = [8, 128], strides = [1, 1]} : vector<8x384xf32> to vector<8x128xf32>
    %165 = arith.addf %163, %164 : vector<8x128xf32>
    %166 = arith.negf %165 : vector<8x128xf32>
    %167 = math.exp %166 : vector<8x128xf32>
    %cst_37 = arith.constant 1.000000e+00 : f32
    %168 = vector.broadcast %cst_37 : f32 to vector<8x128xf32>
    %169 = arith.addf %168, %167 : vector<8x128xf32>
    %170 = arith.divf %168, %169 : vector<8x128xf32>
    %171 = vector.extract_strided_slice %161 {offsets = [0, 128], sizes = [8, 128], strides = [1, 1]} : vector<8x384xf32> to vector<8x128xf32>
    %172 = vector.extract_strided_slice %162 {offsets = [0, 128], sizes = [8, 128], strides = [1, 1]} : vector<8x384xf32> to vector<8x128xf32>
    %173 = arith.addf %171, %172 : vector<8x128xf32>
    %174 = arith.negf %173 : vector<8x128xf32>
    %175 = math.exp %174 : vector<8x128xf32>
    %cst_38 = arith.constant 1.000000e+00 : f32
    %176 = vector.broadcast %cst_38 : f32 to vector<8x128xf32>
    %177 = arith.addf %176, %175 : vector<8x128xf32>
    %178 = arith.divf %176, %177 : vector<8x128xf32>
    %179 = vector.extract_strided_slice %161 {offsets = [0, 256], sizes = [8, 128], strides = [1, 1]} : vector<8x384xf32> to vector<8x128xf32>
    %180 = vector.extract_strided_slice %162 {offsets = [0, 256], sizes = [8, 128], strides = [1, 1]} : vector<8x384xf32> to vector<8x128xf32>
    %181 = arith.addf %180, %9 : vector<8x128xf32>
    %182 = arith.mulf %170, %181 : vector<8x128xf32>
    %183 = arith.addf %179, %182 : vector<8x128xf32>
    %184 = math.tanh %183 : vector<8x128xf32>
    %cst_39 = arith.constant 1.000000e+00 : f32
    %185 = vector.broadcast %cst_39 : f32 to vector<8x128xf32>
    %186 = arith.subf %185, %178 : vector<8x128xf32>
    %187 = arith.mulf %186, %184 : vector<8x128xf32>
    %188 = arith.mulf %178, %159 : vector<8x128xf32>
    %189 = arith.addf %187, %188 : vector<8x128xf32>
    %c40 = arith.constant 40 : index
    %c0_40 = arith.constant 0 : index
    %190 = vector.load %arg8[%c40, %c0_40] : memref<64x128xf32, #tpu.memory_space<vmem>>, vector<8x128xf32>
    tpu.vector_store %arg8[%c40, %c0_40], %189 {strides = array<i32>} : memref<64x128xf32, #tpu.memory_space<vmem>>, vector<8x128xf32>,
    %191 = vector.extract_strided_slice %5 {offsets = [48, 0], sizes = [8, 384], strides = [1, 1]} : vector<64x384xf32> to vector<8x384xf32>
    %cst_41 = arith.constant dense<0.000000e+00> : vector<8x384xf32>
    %192 = tpu.matmul %189, %6, %cst_41 {dimension_numbers = #tpu.dot_dimension_numbers<[1], [0], [0], [1], [0, 0, 1, 1], [], []>} : vector<8x128xf32>, vector<128x384xf32>, vector<8x384xf32> -> vector<8x384xf32>
    %193 = vector.extract_strided_slice %191 {offsets = [0, 0], sizes = [8, 128], strides = [1, 1]} : vector<8x384xf32> to vector<8x128xf32>
    %194 = vector.extract_strided_slice %192 {offsets = [0, 0], sizes = [8, 128], strides = [1, 1]} : vector<8x384xf32> to vector<8x128xf32>
    %195 = arith.addf %193, %194 : vector<8x128xf32>
    %196 = arith.negf %195 : vector<8x128xf32>
    %197 = math.exp %196 : vector<8x128xf32>
    %cst_42 = arith.constant 1.000000e+00 : f32
    %198 = vector.broadcast %cst_42 : f32 to vector<8x128xf32>
    %199 = arith.addf %198, %197 : vector<8x128xf32>
    %200 = arith.divf %198, %199 : vector<8x128xf32>
    %201 = vector.extract_strided_slice %191 {offsets = [0, 128], sizes = [8, 128], strides = [1, 1]} : vector<8x384xf32> to vector<8x128xf32>
    %202 = vector.extract_strided_slice %192 {offsets = [0, 128], sizes = [8, 128], strides = [1, 1]} : vector<8x384xf32> to vector<8x128xf32>
    %203 = arith.addf %201, %202 : vector<8x128xf32>
    %204 = arith.negf %203 : vector<8x128xf32>
    %205 = math.exp %204 : vector<8x128xf32>
    %cst_43 = arith.constant 1.000000e+00 : f32
    %206 = vector.broadcast %cst_43 : f32 to vector<8x128xf32>
    %207 = arith.addf %206, %205 : vector<8x128xf32>
    %208 = arith.divf %206, %207 : vector<8x128xf32>
    %209 = vector.extract_strided_slice %191 {offsets = [0, 256], sizes = [8, 128], strides = [1, 1]} : vector<8x384xf32> to vector<8x128xf32>
    %210 = vector.extract_strided_slice %192 {offsets = [0, 256], sizes = [8, 128], strides = [1, 1]} : vector<8x384xf32> to vector<8x128xf32>
    %211 = arith.addf %210, %9 : vector<8x128xf32>
    %212 = arith.mulf %200, %211 : vector<8x128xf32>
    %213 = arith.addf %209, %212 : vector<8x128xf32>
    %214 = math.tanh %213 : vector<8x128xf32>
    %cst_44 = arith.constant 1.000000e+00 : f32
    %215 = vector.broadcast %cst_44 : f32 to vector<8x128xf32>
    %216 = arith.subf %215, %208 : vector<8x128xf32>
    %217 = arith.mulf %216, %214 : vector<8x128xf32>
    %218 = arith.mulf %208, %189 : vector<8x128xf32>
    %219 = arith.addf %217, %218 : vector<8x128xf32>
    %c48 = arith.constant 48 : index
    %c0_45 = arith.constant 0 : index
    %220 = vector.load %arg8[%c48, %c0_45] : memref<64x128xf32, #tpu.memory_space<vmem>>, vector<8x128xf32>
    tpu.vector_store %arg8[%c48, %c0_45], %219 {strides = array<i32>} : memref<64x128xf32, #tpu.memory_space<vmem>>, vector<8x128xf32>,
    %221 = vector.extract_strided_slice %5 {offsets = [56, 0], sizes = [8, 384], strides = [1, 1]} : vector<64x384xf32> to vector<8x384xf32>
    %cst_46 = arith.constant dense<0.000000e+00> : vector<8x384xf32>
    %222 = tpu.matmul %219, %6, %cst_46 {dimension_numbers = #tpu.dot_dimension_numbers<[1], [0], [0], [1], [0, 0, 1, 1], [], []>} : vector<8x128xf32>, vector<128x384xf32>, vector<8x384xf32> -> vector<8x384xf32>
    %223 = vector.extract_strided_slice %221 {offsets = [0, 0], sizes = [8, 128], strides = [1, 1]} : vector<8x384xf32> to vector<8x128xf32>
    %224 = vector.extract_strided_slice %222 {offsets = [0, 0], sizes = [8, 128], strides = [1, 1]} : vector<8x384xf32> to vector<8x128xf32>
    %225 = arith.addf %223, %224 : vector<8x128xf32>
    %226 = arith.negf %225 : vector<8x128xf32>
    %227 = math.exp %226 : vector<8x128xf32>
    %cst_47 = arith.constant 1.000000e+00 : f32
    %228 = vector.broadcast %cst_47 : f32 to vector<8x128xf32>
    %229 = arith.addf %228, %227 : vector<8x128xf32>
    %230 = arith.divf %228, %229 : vector<8x128xf32>
    %231 = vector.extract_strided_slice %221 {offsets = [0, 128], sizes = [8, 128], strides = [1, 1]} : vector<8x384xf32> to vector<8x128xf32>
    %232 = vector.extract_strided_slice %222 {offsets = [0, 128], sizes = [8, 128], strides = [1, 1]} : vector<8x384xf32> to vector<8x128xf32>
    %233 = arith.addf %231, %232 : vector<8x128xf32>
    %234 = arith.negf %233 : vector<8x128xf32>
    %235 = math.exp %234 : vector<8x128xf32>
    %cst_48 = arith.constant 1.000000e+00 : f32
    %236 = vector.broadcast %cst_48 : f32 to vector<8x128xf32>
    %237 = arith.addf %236, %235 : vector<8x128xf32>
    %238 = arith.divf %236, %237 : vector<8x128xf32>
    %239 = vector.extract_strided_slice %221 {offsets = [0, 256], sizes = [8, 128], strides = [1, 1]} : vector<8x384xf32> to vector<8x128xf32>
    %240 = vector.extract_strided_slice %222 {offsets = [0, 256], sizes = [8, 128], strides = [1, 1]} : vector<8x384xf32> to vector<8x128xf32>
    %241 = arith.addf %240, %9 : vector<8x128xf32>
    %242 = arith.mulf %230, %241 : vector<8x128xf32>
    %243 = arith.addf %239, %242 : vector<8x128xf32>
    %244 = math.tanh %243 : vector<8x128xf32>
    %cst_49 = arith.constant 1.000000e+00 : f32
    %245 = vector.broadcast %cst_49 : f32 to vector<8x128xf32>
    %246 = arith.subf %245, %238 : vector<8x128xf32>
    %247 = arith.mulf %246, %244 : vector<8x128xf32>
    %248 = arith.mulf %238, %219 : vector<8x128xf32>
    %249 = arith.addf %247, %248 : vector<8x128xf32>
    %c56 = arith.constant 56 : index
    %c0_50 = arith.constant 0 : index
    %250 = vector.load %arg8[%c56, %c0_50] : memref<64x128xf32, #tpu.memory_space<vmem>>, vector<8x128xf32>
    tpu.vector_store %arg8[%c56, %c0_50], %249 {strides = array<i32>} : memref<64x128xf32, #tpu.memory_space<vmem>>, vector<8x128xf32>,
    %c0_51 = arith.constant 0 : index
    %c0_52 = arith.constant 0 : index
    %251 = vector.load %arg8[%c0_51, %c0_52] : memref<64x128xf32, #tpu.memory_space<vmem>>, vector<64x128xf32>
    %cst_53 = arith.constant 0.000000e+00 : f32
    %252 = vector.broadcast %cst_53 : f32 to vector<64x128xf32>
    %253 = arith.maximumf %251, %252 : vector<64x128xf32>
    %c0_54 = arith.constant 0 : index
    %c0_55 = arith.constant 0 : index
    %254 = vector.load %arg5[%c0_54, %c0_55] : memref<128x128xf32, #tpu.memory_space<vmem>>, vector<128x128xf32>
    %cst_56 = arith.constant dense<0.000000e+00> : vector<64x128xf32>
    %255 = tpu.matmul %253, %254, %cst_56 {dimension_numbers = #tpu.dot_dimension_numbers<[1], [0], [0], [1], [0, 0, 1, 1], [], []>} : vector<64x128xf32>, vector<128x128xf32>, vector<64x128xf32> -> vector<64x128xf32>
    %c0_57 = arith.constant 0 : index
    %c0_58 = arith.constant 0 : index
    %256 = vector.load %arg6[%c0_57, %c0_58] : memref<1x128xf32, #tpu.memory_space<vmem>>, vector<1x128xf32>
    %257 = vector.broadcast %256 : vector<1x128xf32> to vector<64x128xf32>
    %258 = arith.addf %255, %257 : vector<64x128xf32>
    %c0_59 = arith.constant 0 : index
    %c0_60 = arith.constant 0 : index
    %259 = vector.load %arg7[%c0_59, %c0_60] : memref<64x128xf32, #tpu.memory_space<vmem>>, vector<64x128xf32>
    tpu.vector_store %arg7[%c0_59, %c0_60], %258 {strides = array<i32>} : memref<64x128xf32, #tpu.memory_space<vmem>>, vector<64x128xf32>,
    return
  }
}

</mosaic_0001>

<bundles_post_ra>
// kernel: gru_forward.1
= control target key start
LH: loop header
LB: loop body
LE: loop exit
PB: predicated region body
PF: predicated region fallthrough
CT: control target
= control target key end

     0   :  { %v4002_v3 = vmov 0.0   ;;  %vm2542_vm0 = vmmov 0   ;;  %s3994_s1 = inlined_call_operand.vmem [shape: f32[128,384], index: 1, kind: input, shape index: {}]   ;;  %s3995_s2 = inlined_call_operand.vmem [shape: f32[128,384], index: 2, kind: input, shape index: {}]   ;;  %s3996_s0 = inlined_call_operand.vmem [shape: f32[64,128], index: 0, kind: input, shape index: {}]   ;;  %s3997_s3 = inlined_call_operand.vmem [shape: f32[1,384], index: 3, kind: input, shape index: {}]   ;;  %s3998_s4 = inlined_call_operand.vmem [shape: f32[1,128], index: 4, kind: input, shape index: {}]   ;;  %s3999_s5 = inlined_call_operand.vmem [shape: f32[128,128], index: 5, kind: input, shape index: {}]   ;;  %s4000_s6 = inlined_call_operand.vmem [shape: f32[1,128], index: 6, kind: input, shape index: {}]   ;;  %s4001_s7 = inlined_call_operand.vmem [shape: f32[64,128], index: 7, kind: output, shape index: {}]  }
   0x1   :  { %v80_v0 = vld [vmem:[%s3994_s1 + $0x170] sm:$0xff]  ;;  %v79_v1 = vld [vmem:[%s3994_s1 + $0x168] sm:$0xff]  ;;  %v77_v2 = vld [vmem:[%s3994_s1 + $0x158] sm:$0xff]  ;;  %163 = vmatprep.mubr.f32.mxu1 %v4002_v3  ;;  %436 = vmatprep.mubr.f32.mxu0 %v4002_v3 }
   0x2   :  { %99 = vmatprep.subr.mxu1 %v80_v0  ;;  %v2597_v4 = vld [vmem:[%s3995_s2 + $0x170] sm:$0xff]  ;;  %v2605_v6 = vld [vmem:[%s3995_s2 + $0x168] sm:$0xff]  ;;  %v74_v7 = vld [vmem:[%s3994_s1 + $0x140] sm:$0xff] }
   0x3   :  { %4031 = vst [vmem:[#allocation3_spill] sm:$0xff] %v2597_v4  ;;  %v76_v5 = vld [vmem:[%s3994_s1 + $0x150] sm:$0xff]  ;;  %100 = vmatpush1.msra.mxu1 %v79_v1  ;;  %372 = vmatprep.subr.mxu0 %v2597_v4  ;;  %v2614_v8 = vld [vmem:[%s3995_s2 + $0x158] sm:$0xff]  ;;  %v2628_v11 = vld [vmem:[%s3995_s2 + $0x140] sm:$0xff] }
   0x4   :  { %101 = vmatprep.subr.mxu1 %v77_v2  ;;  %373 = vmatpush1.msra.mxu0 %v2605_v6  ;;  %v73_v9 = vld [vmem:[%s3994_s1 + $0x138] sm:$0xff]  ;;  %v2623_v10 = vld [vmem:[%s3995_s2 + $0x150] sm:$0xff]  ;;  %v71_v12 = vld [vmem:[%s3994_s1 + $0x128] sm:$0xff] }
   0x5   :  { %102 = vmatpush1.msra.mxu1 %v76_v5  ;;  %374 = vmatprep.subr.mxu0 %v2614_v8  ;;  %v2637_v13 = vld [vmem:[%s3995_s2 + $0x138] sm:$0xff]  ;;  %v70_v14 = vld [vmem:[%s3994_s1 + $0x120] sm:$0xff]  ;;  %v2646_v15 = vld [vmem:[%s3995_s2 + $0x128] sm:$0xff] }
   0x6   :  { %103 = vmatprep.subr.mxu1 %v74_v7  ;;  %375 = vmatpush1.msra.mxu0 %v2623_v10  ;;  %v68_v16 = vld [vmem:[%s3994_s1 + $0x110] sm:$0xff]  ;;  %v2655_v17 = vld [vmem:[%s3995_s2 + $0x120] sm:$0xff]  ;;  %v67_v18 = vld [vmem:[%s3994_s1 + $0x108] sm:$0xff] }
   0x7   :  { %104 = vmatpush1.msra.mxu1 %v73_v9  ;;  %376 = vmatprep.subr.mxu0 %v2628_v11  ;;  %v2664_v19 = vld [vmem:[%s3995_s2 + $0x110] sm:$0xff]  ;;  %v65_v20 = vld [vmem:[%s3994_s1 + $0xf8] sm:$0xff]  ;;  %v2673_v21 = vld [vmem:[%s3995_s2 + $0x108] sm:$0xff] }
   0x8   :  { %105 = vmatprep.subr.mxu1 %v71_v12  ;;  %377 = vmatpush1.msra.mxu0 %v2637_v13  ;;  %v64_v22 = vld [vmem:[%s3994_s1 + $0xf0] sm:$0xff]  ;;  %v2682_v23 = vld [vmem:[%s3995_s2 + $0xf8] sm:$0xff]  ;;  %v62_v24 = vld [vmem:[%s3994_s1 + $0xe0] sm:$0xff] }
   0x9   :  { %106 = vmatpush1.msra.mxu1 %v70_v14  ;;  %378 = vmatprep.subr.mxu0 %v2646_v15  ;;  %v2691_v25 = vld [vmem:[%s3995_s2 + $0xf0] sm:$0xff]  ;;  %v61_v26 = vld [vmem:[%s3994_s1 + $0xd8] sm:$0xff]  ;;  %v2700_v27 = vld [vmem:[%s3995_s2 + $0xe0] sm:$0xff] }
   0xa   :  { %107 = vmatprep.subr.mxu1 %v68_v16  ;;  %379 = vmatpush1.msra.mxu0 %v2655_v17  ;;  %v59_v28 = vld [vmem:[%s3994_s1 + $0xc8] sm:$0xff]  ;;  %v2709_v29 = vld [vmem:[%s3995_s2 + $0xd8] sm:$0xff]  ;;  %v58_v30 = vld [vmem:[%s3994_s1 + $0xc0] sm:$0xff] }
   0xb   :  { %108 = vmatpush1.msra.mxu1 %v67_v18  ;;  %380 = vmatprep.subr.mxu0 %v2664_v19  ;;  %v2718_v31 = vld [vmem:[%s3995_s2 + $0xc8] sm:$0xff]  ;;  %v56_v32 = vld [vmem:[%s3994_s1 + $0xb0] sm:$0xff]  ;;  %v2727_v33 = vld [vmem:[%s3995_s2 + $0xc0] sm:$0xff] }
   0xc   :  { %109 = vmatprep.subr.mxu1 %v65_v20  ;;  %381 = vmatpush1.msra.mxu0 %v2673_v21  ;;  %v55_v34 = vld [vmem:[%s3994_s1 + $0xa8] sm:$0xff]  ;;  %v2736_v35 = vld [vmem:[%s3995_s2 + $0xb0] sm:$0xff]  ;;  %v53_v36 = vld [vmem:[%s3994_s1 + $0x98] sm:$0xff] }
   0xd   :  { %110 = vmatpush1.msra.mxu1 %v64_v22  ;;  %382 = vmatprep.subr.mxu0 %v2682_v23  ;;  %v2745_v37 = vld [vmem:[%s3995_s2 + $0xa8] sm:$0xff]  ;;  %v52_v38 = vld [vmem:[%s3994_s1 + $0x90] sm:$0xff]  ;;  %v2754_v39 = vld [vmem:[%s3995_s2 + $0x98] sm:$0xff] }
   0xe   :  { %111 = vmatprep.subr.mxu1 %v62_v24  ;;  %383 = vmatpush1.msra.mxu0 %v2691_v25  ;;  %v50_v40 = vld [vmem:[%s3994_s1 + $0x80] sm:$0xff]  ;;  %v2763_v41 = vld [vmem:[%s3995_s2 + $0x90] sm:$0xff]  ;;  %v49_v42 = vld [vmem:[%s3994_s1 + $0x78] sm:$0xff] }
   0xf   :  { %112 = vmatpush1.msra.mxu1 %v61_v26  ;;  %384 = vmatprep.subr.mxu0 %v2700_v27  ;;  %v2772_v43 = vld [vmem:[%s3995_s2 + $0x80] sm:$0xff]  ;;  %v47_v44 = vld [vmem:[%s3994_s1 + $0x68] sm:$0xff]  ;;  %v2781_v45 = vld [vmem:[%s3995_s2 + $0x78] sm:$0xff] }
  0x10   :  { %113 = vmatprep.subr.mxu1 %v59_v28  ;;  %385 = vmatpush1.msra.mxu0 %v2709_v29  ;;  %v46_v46 = vld [vmem:[%s3994_s1 + $0x60] sm:$0xff]  ;;  %v2790_v47 = vld [vmem:[%s3995_s2 + $0x68] sm:$0xff]  ;;  %v44_v48 = vld [vmem:[%s3994_s1 + $0x50] sm:$0xff] }
  0x11   :  { %114 = vmatpush1.msra.mxu1 %v58_v30  ;;  %386 = vmatprep.subr.mxu0 %v2718_v31  ;;  %v2799_v49 = vld [vmem:[%s3995_s2 + $0x60] sm:$0xff]  ;;  %v43_v50 = vld [vmem:[%s3994_s1 + $0x48] sm:$0xff]  ;;  %v2808_v51 = vld [vmem:[%s3995_s2 + $0x50] sm:$0xff] }
  0x12   :  { %115 = vmatprep.subr.mxu1 %v56_v32  ;;  %387 = vmatpush1.msra.mxu0 %v2727_v33  ;;  %v41_v52 = vld [vmem:[%s3994_s1 + $0x38] sm:$0xff]  ;;  %v2817_v53 = vld [vmem:[%s3995_s2 + $0x48] sm:$0xff]  ;;  %v40_v54 = vld [vmem:[%s3994_s1 + $0x30] sm:$0xff] }
  0x13   :  { %116 = vmatpush1.msra.mxu1 %v55_v34  ;;  %388 = vmatprep.subr.mxu0 %v2736_v35  ;;  %v2826_v55 = vld [vmem:[%s3995_s2 + $0x38] sm:$0xff]  ;;  %v38_v56 = vld [vmem:[%s3994_s1 + $0x20] sm:$0xff]  ;;  %v2835_v57 = vld [vmem:[%s3995_s2 + $0x30] sm:$0xff] }
  0x14   :  { %117 = vmatprep.subr.mxu1 %v53_v36  ;;  %389 = vmatpush1.msra.mxu0 %v2745_v37  ;;  %v37_v58 = vld [vmem:[%s3994_s1 + $0x18] sm:$0xff]  ;;  %v2844_v59 = vld [vmem:[%s3995_s2 + $0x20] sm:$0xff]  ;;  %v35_v60 = vld [vmem:[%s3994_s1 + $0x8] sm:$0xff] }
  0x15   :  { %118 = vmatpush1.msra.mxu1 %v52_v38  ;;  %390 = vmatprep.subr.mxu0 %v2754_v39  ;;  %v2853_v61 = vld [vmem:[%s3995_s2 + $0x18] sm:$0xff]  ;;  %v34_v62 = vld [vmem:[%s3994_s1] sm:$0xff]  ;;  %v2862_v63 = vld [vmem:[%s3995_s2 + $0x8] sm:$0xff] }
  0x16   :  { %119 = vmatprep.subr.mxu1 %v50_v40  ;;  %391 = vmatpush1.msra.mxu0 %v2763_v41  ;;  %4032 = vst [vmem:[#allocation4_spill] sm:$0xff] %v2853_v61  ;;  %4033 = vst [vmem:[#allocation5_spill] sm:$0xff] %v2862_v63  ;;  %v2868_v0 = vld [vmem:[%s3996_s0] sm:$0xff]  ;;  %v81_v1 = vld [vmem:[%s3994_s1 + $0x178] sm:$0xff] }
  0x17   :  { %120 = vmatpush1.msra.mxu1 %v49_v42  ;;  %392 = vmatprep.subr.mxu0 %v2772_v43  ;;  %v2877_v2 = vld [vmem:[%s3995_s2] sm:$0xff]  ;;  %v2888_v7 = vld [vmem:[%s3996_s0 + $0x8] sm:$0xff]  ;;  %v72_v12 = vld [vmem:[%s3994_s1 + $0x130] sm:$0xff] }
  0x18   :  { %121 = vmatprep.subr.mxu1 %v47_v44  ;;  %393 = vmatpush1.msra.mxu0 %v2781_v45  ;;  %4034 = vst [vmem:[#allocation6_spill] sm:$0xff] %v2877_v2  ;;  %v78_v5 = vld [vmem:[%s3994_s1 + $0x160] sm:$0xff]  ;;  %v75_v9 = vld [vmem:[%s3994_s1 + $0x148] sm:$0xff]  ;;  %v2903_v14 = vld [vmem:[%s3996_s0 + $0x10] sm:$0xff] }
  0x19   :  { %122 = vmatpush1.msra.mxu1 %v46_v46  ;;  %394 = vmatprep.subr.mxu0 %v2790_v47  ;;  %v69_v16 = vld [vmem:[%s3994_s1 + $0x118] sm:$0xff]  ;;  %v66_v18 = vld [vmem:[%s3994_s1 + $0x100] sm:$0xff]  ;;  %v63_v22 = vld [vmem:[%s3994_s1 + $0xe8] sm:$0xff] }
  0x1a   :  { %123 = vmatprep.subr.mxu1 %v44_v48  ;;  %395 = vmatpush1.msra.mxu0 %v2799_v49  ;;  %v2918_v20 = vld [vmem:[%s3996_s0 + $0x18] sm:$0xff]  ;;  %v60_v24 = vld [vmem:[%s3994_s1 + $0xd0] sm:$0xff]  ;;  %v30_v26 = vld [vmem:[%s3996_s0 + $0x20] sm:$0xff] }
  0x1b   :  { %124 = vmatpush1.msra.mxu1 %v43_v50  ;;  %396 = vmatprep.subr.mxu0 %v2808_v51  ;;  %v57_v28 = vld [vmem:[%s3994_s1 + $0xb8] sm:$0xff]  ;;  %v54_v30 = vld [vmem:[%s3994_s1 + $0xa0] sm:$0xff]  ;;  %v31_v32 = vld [vmem:[%s3996_s0 + $0x28] sm:$0xff] }
  0x1c   :  { %125 = vmatprep.subr.mxu1 %v41_v52  ;;  %397 = vmatpush1.msra.mxu0 %v2817_v53  ;;  %v51_v34 = vld [vmem:[%s3994_s1 + $0x88] sm:$0xff]  ;;  %v48_v36 = vld [vmem:[%s3994_s1 + $0x70] sm:$0xff]  ;;  %v45_v40 = vld [vmem:[%s3994_s1 + $0x58] sm:$0xff] }
  0x1d   :  { %126 = vmatpush1.msra.mxu1 %v40_v54  ;;  %398 = vmatprep.subr.mxu0 %v2826_v55  ;;  %v32_v38 = vld [vmem:[%s3996_s0 + $0x30] sm:$0xff]  ;;  %v42_v42 = vld [vmem:[%s3994_s1 + $0x40] sm:$0xff]  ;;  %v33_v44 = vld [vmem:[%s3996_s0 + $0x38] sm:$0xff] }
  0x1e   :  { %127 = vmatprep.subr.mxu1 %v38_v56  ;;  %399 = vmatpush1.msra.mxu0 %v2835_v57  ;;  %v39_v46 = vld [vmem:[%s3994_s1 + $0x28] sm:$0xff]  ;;  %v36_v48 = vld [vmem:[%s3994_s1 + $0x10] sm:$0xff]  ;;  %v2981_v50 = vld [vmem:[%s3995_s2 + $0x178] sm:$0xff] }
  0x1f   :  { %128 = vmatpush1.msra.mxu1 %v37_v58  ;;  %400 = vmatprep.subr.mxu0 %v2844_v59  ;;  %v2990_v52 = vld [vmem:[%s3995_s2 + $0x160] sm:$0xff]  ;;  %v2998_v54 = vld [vmem:[%s3995_s2 + $0x148] sm:$0xff]  ;;  %v3007_v56 = vld [vmem:[%s3995_s2 + $0x130] sm:$0xff] }
  0x20   :  { %129 = vmatprep.subr.mxu1 %v35_v60  ;;  %401 = vmatpush1.msra.mxu0 %v2853_v61  ;;  %v3015_v58 = vld [vmem:[%s3995_s2 + $0x118] sm:$0xff]  ;;  %v3024_v60 = vld [vmem:[%s3995_s2 + $0x100] sm:$0xff] }
  0x21   :  { %130 = vmatpush1.msra.mxu1 %v34_v62  ;;  %402 = vmatprep.subr.mxu0 %v2862_v63  ;;  %v3031_v62 = vld [vmem:[%s3995_s2 + $0xe8] sm:$0xff] }
  0x22   :  { %164 = vmatmul.mubr.f32.vlgmr.msra.gmra.mxu1 %v2868_v0  ;;  %2042 = vmatprep.subr.mxu1 %v81_v1 }
  0x23   :  { %2043 = vmatpush3.msra.mxu1 %v81_v1  ;;  %403 = vmatpush1.msra.mxu0 %v2877_v2  ;;  %v3049_v1 = vld [vmem:[%s3995_s2 + $0xb8] sm:$0xff] }
  0x24   :  { %2044 = vmatprep.subr.mxu1 %v78_v5  ;;  %437 = vmatmul.mubr.f32.vlgmr.msra.gmra.mxu0 %v4002_v3 }
  0x25   :  { %169 = vmatprep.mubr.f32.mxu1 %v4002_v3  ;;  %2045 = vmatpush3.msra.mxu1 %v78_v5  ;;  %v3058_v5 = vld [vmem:[%s3995_s2 + $0xa0] sm:$0xff] }
  0x26   :  { %170 = vmatmul.mubr.f32.gmra.mxu1 %v2888_v7  ;;  %2046 = vmatprep.subr.mxu1 %v75_v9 }
  0x27   :  { %2047 = vmatpush3.msra.mxu1 %v75_v9  ;;  %175 = vmatprep.mubr.f32.mxu1 %v4002_v3  ;;  %v3076_v9 = vld [vmem:[%s3995_s2 + $0x70] sm:$0xff] }
  0x28   :  { %2048 = vmatprep.subr.mxu1 %v72_v12  ;;  %536 = vmatprep.subr.mxu0 %v2597_v4 }
  0x29   :  { %2049 = vmatpush3.msra.mxu1 %v72_v12  ;;  %537 = vmatpush1.msra.mxu0 %v2605_v6  ;;  %v3085_v12 = vld [vmem:[%s3995_s2 + $0x58] sm:$0xff] }
  0x2a   :  { %176 = vmatmul.mubr.f32.gmra.mxu1 %v2903_v14  ;;  %2050 = vmatprep.subr.mxu1 %v69_v16 }
  0x2b   :  { %2051 = vmatpush3.msra.mxu1 %v69_v16  ;;  %181 = vmatprep.mubr.f32.mxu1 %v4002_v3  ;;  %v3103_v16 = vld [vmem:[%s3995_s2 + $0x28] sm:$0xff] }
  0x2c   :  { %2052 = vmatprep.subr.mxu1 %v66_v18  ;;  %538 = vmatprep.subr.mxu0 %v2614_v8  ;;  %4035 = vst [vmem:[#allocation7_spill] sm:$0xff] %v3103_v16 }
  0x2d   :  { %2053 = vmatpush3.msra.mxu1 %v66_v18  ;;  %539 = vmatpush1.msra.mxu0 %v2623_v10  ;;  %v3112_v18 = vld [vmem:[%s3995_s2 + $0x10] sm:$0xff] }
  0x2e   :  { %182 = vmatmul.mubr.f32.gmra.mxu1 %v2918_v20  ;;  %2054 = vmatprep.subr.mxu1 %v63_v22  ;;  %4036 = vst [vmem:[#allocation8_spill] sm:$0xff] %v3112_v18 }
  0x2f   :  { %2055 = vmatpush3.msra.mxu1 %v63_v22  ;;  %187 = vmatprep.mubr.f32.mxu1 %v4002_v3 }
  0x30   :  { %2056 = vmatprep.subr.mxu1 %v60_v24  ;;  %540 = vmatprep.subr.mxu0 %v2628_v11 }
  0x31   :  { %2057 = vmatpush3.msra.mxu1 %v60_v24  ;;  %541 = vmatpush1.msra.mxu0 %v2637_v13 }
  0x32   :  { %188 = vmatmul.mubr.f32.gmra.mxu1 %v30_v26  ;;  %2058 = vmatprep.subr.mxu1 %v57_v28 }
  0x33   :  { %2059 = vmatpush3.msra.mxu1 %v57_v28  ;;  %193 = vmatprep.mubr.f32.mxu1 %v4002_v3 }
  0x34   :  { %2060 = vmatprep.subr.mxu1 %v54_v30  ;;  %542 = vmatprep.subr.mxu0 %v2646_v15 }
  0x35   :  { %2061 = vmatpush3.msra.mxu1 %v54_v30  ;;  %543 = vmatpush1.msra.mxu0 %v2655_v17 }
  0x36   :  { %194 = vmatmul.mubr.f32.gmra.mxu1 %v31_v32  ;;  %2062 = vmatprep.subr.mxu1 %v51_v34 }
  0x37   :  { %2063 = vmatpush3.msra.mxu1 %v51_v34  ;;  %199 = vmatprep.mubr.f32.mxu1 %v4002_v3 }
  0x38   :  { %2064 = vmatprep.subr.mxu1 %v48_v36  ;;  %544 = vmatprep.subr.mxu0 %v2664_v19 }
  0x39   :  { %2065 = vmatpush3.msra.mxu1 %v48_v36  ;;  %545 = vmatpush1.msra.mxu0 %v2673_v21 }
  0x3a   :  { %200 = vmatmul.mubr.f32.gmra.mxu1 %v32_v38  ;;  %2066 = vmatprep.subr.mxu1 %v45_v40 }
  0x3b   :  { %2067 = vmatpush3.msra.mxu1 %v45_v40  ;;  %205 = vmatprep.mubr.f32.mxu1 %v4002_v3 }
  0x3c   :  { %2068 = vmatprep.subr.mxu1 %v42_v42  ;;  %546 = vmatprep.subr.mxu0 %v2682_v23 }
  0x3d   :  { %2069 = vmatpush3.msra.mxu1 %v42_v42  ;;  %547 = vmatpush1.msra.mxu0 %v2691_v25 }
  0x3e   :  { %206 = vmatmul.mubr.f32.gmra.mxu1 %v33_v44  ;;  %2070 = vmatprep.subr.mxu1 %v39_v46 }
  0x3f   :  { %2071 = vmatpush3.msra.mxu1 %v39_v46  ;;  %2074 = vmatprep.mubr.f32.mxu1 %v2868_v0  ;;  %v3040_v0 = vld [vmem:[%s3995_s2 + $0xd0] sm:$0xff] }
  0x40   :  { %2072 = vmatprep.subr.mxu1 %v36_v48  ;;  %548 = vmatprep.subr.mxu0 %v2700_v27 }
  0x41   :  { %2073 = vmatpush3.msra.mxu1 %v36_v48  ;;  %549 = vmatpush1.msra.mxu0 %v2709_v29 }
  0x42   :  { %2075 = vmatmul.mubr.f32.vlgmr.msra.gmra.mxu1 %v2888_v7  ;;  %2086 = vmatprep.subr.mxu1 %v4002_v3  ;;  %v3067_v7 = vld [vmem:[%s3995_s2 + $0x88] sm:$0xff] }
  0x43   :  { %2087 = vmatpush3.msra.mxu1 %v2981_v50  ;;  %2077 = vmatprep.mubr.f32.mxu1 %v2903_v14  ;;  %v3094_v14 = vld [vmem:[%s3995_s2 + $0x40] sm:$0xff] }
  0x44   :  { %2088 = vmatprep.subr.mxu1 %v4002_v3  ;;  %550 = vmatprep.subr.mxu0 %v2718_v31 }
  0x45   :  { %2089 = vmatpush3.msra.mxu1 %v2990_v52  ;;  %551 = vmatpush1.msra.mxu0 %v2727_v33 }
  0x46   :  { %2090 = vmatprep.subr.mxu1 %v4002_v3  ;;  %2078 = vmatmul.mubr.f32.gmra.mxu1 %v2918_v20  ;;  %v84_v20 = vlaneseq }
  0x47   :  { %2091 = vmatpush3.msra.mxu1 %v2998_v54  ;;  %2080 = vmatprep.mubr.f32.mxu1 %v30_v26  ;;  %v82_v26 = vld [vmem:[%s3997_s3] sm:$0x7] }
  0x48   :  { %2092 = vmatprep.subr.mxu1 %v4002_v3  ;;  %552 = vmatprep.subr.mxu0 %v2736_v35  ;;  %v85_v22 = vshrl.u32 %v84_v20, 7 }
  0x49   :  { %2093 = vmatpush3.msra.mxu1 %v3007_v56  ;;  %553 = vmatpush1.msra.mxu0 %v2745_v37 }
  0x4a   :  { %2094 = vmatprep.subr.mxu1 %v4002_v3  ;;  %2081 = vmatmul.mubr.f32.gmra.mxu1 %v31_v32  ;;  %v86_v24 = vsub.s32 0, %v85_v22  ;;  %v90_v30 = vsub.s32 1, %v85_v22 }
  0x4b   :  { %2095 = vmatpush3.msra.mxu1 %v3015_v58  ;;  %2083 = vmatprep.mubr.f32.mxu1 %v32_v38 }
  0x4c   :  { %2096 = vmatprep.subr.mxu1 %v4002_v3  ;;  %554 = vmatprep.subr.mxu0 %v2754_v39  ;;  %v87_v34 = vrot.slane %v82_v26, %v86_v24  ;;  %v91_v38 = vrot.slane %v82_v26, %v90_v30 }
  0x4d   :  { %2097 = vmatpush3.msra.mxu1 %v3024_v60  ;;  %555 = vmatpush1.msra.mxu0 %v2763_v41 }
  0x4e   :  { %2098 = vmatprep.subr.mxu1 %v4002_v3  ;;  %2084 = vmatmul.mubr.f32.gmra.mxu1 %v33_v44 }
  0x4f   :  { %2099 = vmatpush3.msra.mxu1 %v3031_v62  ;;  %2118 = vmatprep.mubr.msk.f32.mxu1 %vm2542_vm0, %v4002_v3 }
  0x50   :  { %2100 = vmatprep.subr.mxu1 %v4002_v3  ;;  %556 = vmatprep.subr.mxu0 %v2772_v43 }
  0x51   :  { %2101 = vmatpush3.msra.mxu1 %v3040_v0  ;;  %557 = vmatpush1.msra.mxu0 %v2781_v45 }
  0x52   :  { %2102 = vmatprep.subr.mxu1 %v4002_v3  ;;  %558 = vmatprep.subr.mxu0 %v2790_v47 }
  0x53   :  { %2103 = vmatpush3.msra.mxu1 %v3049_v1  ;;  %559 = vmatpush1.msra.mxu0 %v2799_v49 }
  0x54   :  { %2104 = vmatprep.subr.mxu1 %v4002_v3  ;;  %560 = vmatprep.subr.mxu0 %v2808_v51 }
  0x55   :  { %2105 = vmatpush3.msra.mxu1 %v3058_v5  ;;  %561 = vmatpush1.msra.mxu0 %v2817_v53 }
  0x56   :  { %2106 = vmatprep.subr.mxu1 %v4002_v3  ;;  %562 = vmatprep.subr.mxu0 %v2826_v55 }
  0x57   :  { %2107 = vmatpush3.msra.mxu1 %v3067_v7  ;;  %563 = vmatpush1.msra.mxu0 %v2835_v57 }
  0x58   :  { %2108 = vmatprep.subr.mxu1 %v4002_v3  ;;  %564 = vmatprep.subr.mxu0 %v2844_v59 }
  0x59   :  { %2109 = vmatpush3.msra.mxu1 %v3076_v9  ;;  %565 = vmatpush1.msra.mxu0 %v2853_v61 }
  0x5a   :  { %2110 = vmatprep.subr.mxu1 %v4002_v3  ;;  %566 = vmatprep.subr.mxu0 %v2862_v63 }
  0x5b   :  { %2111 = vmatpush3.msra.mxu1 %v3085_v12  ;;  %567 = vmatpush1.msra.mxu0 %v2877_v2 }
  0x5c   :  { %2112 = vmatprep.subr.mxu1 %v4002_v3  ;;  %600 = vmatprep.mubr.f32.mxu0 %v4002_v3 }
  0x5d   :  { %2113 = vmatpush3.msra.mxu1 %v3094_v14  ;;  %700 = vmatprep.subr.mxu0 %v2597_v4 }
  0x5e   :  { %2114 = vmatprep.subr.mxu1 %v4002_v3 }
  0x5f   :  { %2115 = vmatpush3.msra.mxu1 %v3103_v16 }
  0x60   :  { %2116 = vmatprep.subr.mxu1 %v4002_v3 }
  0x61   :  { %2117 = vmatpush3.msra.mxu1 %v3112_v18 }
  0x62   :  { %2119 = vmatmul.mubr.f32.vlgmr.msra.gmra.mxu1 %v4002_v3  ;;  %2121 = vmatprep.subr.mxu1 %v4002_v3 }
  0x63   :  { %2122 = vmatpush3.msra.mxu1 %v2981_v50  ;;  %2153 = vmatprep.mubr.msk.f32.mxu1 %vm2542_vm0, %v4002_v3 }
  0x64   :  { %2123 = vmatprep.subr.mxu1 %v4002_v3 }
  0x65   :  { %2124 = vmatpush3.msra.mxu1 %v2990_v52 }
  0x66   :  { %2125 = vmatprep.subr.mxu1 %v4002_v3 }
  0x67   :  { %2126 = vmatpush3.msra.mxu1 %v2998_v54 }
  0x68   :  { %2127 = vmatprep.subr.mxu1 %v4002_v3 }
  0x69   :  { %2128 = vmatpush3.msra.mxu1 %v3007_v56 }
  0x6a   :  { %2129 = vmatprep.subr.mxu1 %v4002_v3 }
  0x6b   :  { %2130 = vmatpush3.msra.mxu1 %v3015_v58 }
  0x6c   :  { %2131 = vmatprep.subr.mxu1 %v4002_v3 }
  0x6d   :  { %2132 = vmatpush3.msra.mxu1 %v3024_v60 }
  0x6e   :  { %2133 = vmatprep.subr.mxu1 %v4002_v3 }
  0x6f   :  { %2134 = vmatpush3.msra.mxu1 %v3031_v62 }
  0x70   :  { %2135 = vmatprep.subr.mxu1 %v4002_v3 }
  0x71   :  { %2136 = vmatpush3.msra.mxu1 %v3040_v0 }
  0x72   :  { %2137 = vmatprep.subr.mxu1 %v4002_v3 }
  0x73   :  { %2138 = vmatpush3.msra.mxu1 %v3049_v1 }
  0x74   :  { %2139 = vmatprep.subr.mxu1 %v4002_v3 }
  0x75   :  { %2140 = vmatpush3.msra.mxu1 %v3058_v5 }
  0x76   :  { %2141 = vmatprep.subr.mxu1 %v4002_v3 }
  0x77   :  { %2142 = vmatpush3.msra.mxu1 %v3067_v7 }
  0x78   :  { %2143 = vmatprep.subr.mxu1 %v4002_v3 }
  0x79   :  { %2144 = vmatpush3.msra.mxu1 %v3076_v9 }
  0x7a   :  { %2145 = vmatprep.subr.mxu1 %v4002_v3 }
  0x7b   :  { %2146 = vmatpush3.msra.mxu1 %v3085_v12 }
  0x7c   :  { %2147 = vmatprep.subr.mxu1 %v4002_v3 }
  0x7d   :  { %2148 = vmatpush3.msra.mxu1 %v3094_v14 }
  0x7e   :  { %2149 = vmatprep.subr.mxu1 %v4002_v3 }
  0x7f   :  { %2150 = vmatpush3.msra.mxu1 %v3103_v16 }
  0x80   :  { %2151 = vmatprep.subr.mxu1 %v4002_v3 }
  0x81   :  { %2152 = vmatpush3.msra.mxu1 %v3112_v18 }
  0x82   :  { %2156 = vmatprep.subr.mxu1 %v4002_v3 }
  0xe2   :  { %v165_v28 = vpop.f32.mrf.mxu1 }
  0xe4   :  { %v167_v32 = vpop.f32.mrf.mxu1 }
  0xe6   :  { %v171_v36 = vpop.f32.mrf.mxu1 }
  0xe7   :  { %v3156_v40 = vadd.f32 %v171_v36, %v87_v34 }
  0xe8   :  { %v173_v42 = vpop.f32.mrf.mxu1 }
  0xe9   :  { %4037 = vst [vmem:[#allocation9_spill] sm:$0xff] %v3156_v40  ;;  %v3158_v44 = vadd.f32 %v173_v42, %v91_v38 }
  0xea   :  { %v177_v46 = vpop.f32.mrf.mxu1 }
  0xeb   :  { %4038 = vst [vmem:[#allocation10_spill] sm:$0xff] %v3158_v44  ;;  %v3160_v48 = vadd.f32 %v177_v46, %v87_v34  ;;  %v166_v44 = vadd.f32 %v165_v28, %v87_v34  ;;  %v438_v46 = vpop.f32.mrf.mxu0 }
  0xec   :  { %v179_v20 = vpop.f32.mrf.mxu1 }
  0xed   :  { %4039 = vst [vmem:[#allocation11_spill] sm:$0xff] %v3160_v48  ;;  %v3162_v3 = vadd.f32 %v179_v20, %v91_v38 }
  0xee   :  { %v183_v4 = vpop.f32.mrf.mxu1 }
  0xef   :  { %4040 = vst [vmem:[#allocation12_spill] sm:$0xff] %v3162_v3  ;;  %v3164_v18 = vadd.f32 %v183_v4, %v87_v34  ;;  %v513_v4 = vadd.f32 %v438_v46, %v166_v44  ;;  %v168_v44 = vadd.f32 %v167_v32, %v91_v38 }
  0xf0   :  { %v185_v2 = vpop.f32.mrf.mxu1 }
  0xf1   :  { %4041 = vst [vmem:[#allocation13_spill] sm:$0xff] %v3164_v18  ;;  %v3166_v63 = vadd.f32 %v185_v2, %v91_v38  ;;  %v94_v2 = vsub.s32 2, %v85_v22 }
  0xf2   :  { %v189_v24 = vpop.f32.mrf.mxu1 }
  0xf3   :  { %4042 = vst [vmem:[#allocation14_spill] sm:$0xff] %v3166_v63  ;;  %v3168_v16 = vadd.f32 %v189_v24, %v87_v34 }
  0xf4   :  { %v191_v30 = vpop.f32.mrf.mxu1 }
  0xf5   :  { %4043 = vst [vmem:[#allocation15_spill] sm:$0xff] %v3168_v16  ;;  %v3170_v36 = vadd.f32 %v191_v30, %v91_v38  ;;  %v1841_v16 = vmul.f32 -1.442695, %v513_v4 }
  0xf6   :  { %v195_v42 = vpop.f32.mrf.mxu1 }
  0xf7   :  { %4044 = vst [vmem:[#allocation16_spill] sm:$0xff] %v3170_v36  ;;  %v3172_v40 = vadd.f32 %v195_v42, %v87_v34  ;;  %v95_v36 = vrot.slane %v82_v26, %v94_v2  ;;  %2412 = vpow2.f32 %v1841_v16 }
  0xf8   :  { %v197_v48 = vpop.f32.mrf.mxu1 }
  0xf9   :  { %4045 = vst [vmem:[#allocation17_spill] sm:$0xff] %v3172_v40  ;;  %v3174_v20 = vadd.f32 %v197_v48, %v91_v38 }
  0xfa   :  { %v201_v3 = vpop.f32.mrf.mxu1 }
  0xfb   :  { %4046 = vst [vmem:[#allocation18_spill] sm:$0xff] %v3174_v20  ;;  %v3176_v18 = vadd.f32 %v201_v3, %v87_v34  ;;  %v440_v3 = vpop.f32.mrf.mxu0 }
  0xfc   :  { %v203_v63 = vpop.f32.mrf.mxu1 }
  0xfd   :  { %4047 = vst [vmem:[#allocation19_spill] sm:$0xff] %v3176_v18  ;;  %v3178_v61 = vadd.f32 %v203_v63, %v91_v38 }
  0xfe   :  { %v207_v24 = vpop.f32.mrf.mxu1 }
  0xff   :  { %4048 = vst [vmem:[#allocation20_spill] sm:$0xff] %v3178_v61  ;;  %v3180_v30 = vadd.f32 %v207_v24, %v87_v34  ;;  %v520_v61 = vadd.f32 %v440_v3, %v168_v44  ;;  %v3201_v3 = vld [vmem:[%s3998_s4] ss:$0 sm:$0xff] }
 0x100   :  { %v209_v28 = vpop.f32.mrf.mxu1 }
 0x101   :  { %4049 = vst [vmem:[#allocation21_spill] sm:$0xff] %v3180_v30  ;;  %v3182_v42 = vadd.f32 %v209_v28, %v91_v38  ;;  %v1842_v2 = vmul.f32 -1.442695, %v520_v61 }
 0x102   :  { %v2076_v40 = vpop.f32.mrf.mxu1 }
 0x103   :  { %4050 = vst [vmem:[#allocation22_spill] sm:$0xff] %v3182_v42  ;;  %v3184_v48 = vadd.f32 %v2076_v40, %v95_v36  ;;  %2414 = vpow2.f32 %v1842_v2 }
 0x104   :  { %v278_v20 = vpop.f32.mrf.mxu1  ;;  %v2413_v28 = vpop.eup %2412 }
 0x106   :  { %v2079_v46 = vpop.f32.mrf.mxu1 }
 0x107   :  { %v3186_v22 = vadd.f32 %v2079_v46, %v95_v36  ;;  %v517_v46 = vadd.f32 1.0, %v2413_v28 }
 0x108   :  { %v288_v63 = vpop.f32.mrf.mxu1 }
 0x109   :  { %4051 = vst [vmem:[#allocation23_spill] sm:$0xff] %v3186_v22  ;;  %v3188_v18 = vadd.f32 %v288_v63, %v95_v36  ;;  %2416 = vrcp.f32 %v517_v46 }
 0x10a   :  { %v2082_v34 = vpop.f32.mrf.mxu1 }
 0x10b   :  { %4052 = vst [vmem:[#allocation24_spill] sm:$0xff] %v3188_v18  ;;  %v3190_v4 = vadd.f32 %v2082_v34, %v95_v36 }
 0x10c   :  { %v298_v26 = vpop.f32.mrf.mxu1 }
 0x10d   :  { %4053 = vst [vmem:[#allocation25_spill] sm:$0xff] %v3190_v4  ;;  %v3192_v24 = vadd.f32 %v298_v26, %v95_v36 }
 0x10e   :  { %v2085_v16 = vpop.f32.mrf.mxu1 }
 0x10f   :  { %4054 = vst [vmem:[#allocation26_spill] sm:$0xff] %v3192_v24  ;;  %v3194_v40 = vadd.f32 %v2085_v16, %v95_v36 }
 0x110   :  { %v308_v32 = vpop.f32.mrf.mxu1  ;;  %v2415_v44 = vpop.eup %2414 }
 0x111   :  { %4055 = vst [vmem:[#allocation27_spill] sm:$0xff] %v3194_v40  ;;  %v3196_v38 = vadd.f32 %v308_v32, %v95_v36  ;;  %v524_v63 = vadd.f32 1.0, %v2415_v44  ;;  %v279_v40 = vadd.f32 %v278_v20, %v95_v36  ;;  %v4058_v36 = vmov 0.0   ;;  %v4059_v20 = vld [vmem:[#allocation4_spill] sm:$0xff]  ;;  %v4064_v44 = vld [vmem:[#allocation3_spill] sm:$0xff] }
 0x113   :  { %4056 = vst [vmem:[#allocation28_spill] sm:$0xff] %v3196_v38  ;;  %2418 = vrcp.f32 %v524_v63 }
 0x116   :  { %v2417_v26 = vpop.eup %2416 }
 0x120   :  { %v2419_v32 = vpop.eup %2418 }
 0x121   :  { %v531_v28 = vsub.f32 1.0, %v2419_v32  ;;  %v533_v38 = vmul.f32 0.0, %v2419_v32 }
 0x122   :  { %v509_v61 = vpop.f32.mrf.mxu1 }
 0x123   :  { %v527_v34 = vadd.f32 %v3201_v3, %v509_v61 }
 0x124   :  { %v2120_v16 = vpop.f32.mrf.mxu1 }
 0x125   :  { %v528_v42 = vmul.f32 %v2417_v26, %v527_v34  ;;  %v4065_v34 = vld [vmem:[#allocation9_spill] sm:$0xff] }
 0x127   :  { %v529_v2 = vadd.f32 %v528_v42, %v279_v40  ;;  %v4061_v42 = vld [vmem:[#allocation5_spill] sm:$0xff]  ;;  %v4062_v40 = vld [vmem:[#allocation6_spill] sm:$0xff] }
 0x129   :  { %2420 = vtanh.f32 %v529_v2 }
 0x136   :  { %v2421_v46 = vpop.eup %2420 }
 0x137   :  { %v532_v30 = vmul.f32 %v2421_v46, %v531_v28  ;;  %v4066_v28 = vld [vmem:[#allocation10_spill] sm:$0xff] }
 0x139   :  { %v3204_v4 = vadd.f32 %v533_v38, %v532_v30  ;;  %v4060_v30 = vld [vmem:[#allocation7_spill] sm:$0xff]  ;;  %v4063_v38 = vld [vmem:[#allocation8_spill] sm:$0xff] }
 0x13b   :  { %4057 = vst [vmem:[#allocation29_spill] sm:$0xff] %v3204_v4  ;;  %601 = vmatmul.mubr.f32.vlgmr.msra.gmra.mxu0 %v3204_v4  ;;  %2154 = vmatmul.mubr.f32.vlgmr.msra.gmra.mxu1 %v3204_v4 }
 0x13c   :  { %701 = vmatpush1.msra.mxu0 %v2605_v6  ;;  %2157 = vmatpush3.msra.mxu1 %v2981_v50 }
 0x13d   :  { %702 = vmatprep.subr.mxu0 %v2614_v8  ;;  %2158 = vmatprep.subr.mxu1 %v4058_v36 }
 0x13e   :  { %703 = vmatpush1.msra.mxu0 %v2623_v10  ;;  %2159 = vmatpush3.msra.mxu1 %v2990_v52 }
 0x13f   :  { %704 = vmatprep.subr.mxu0 %v2628_v11  ;;  %2160 = vmatprep.subr.mxu1 %v4058_v36 }
 0x140   :  { %705 = vmatpush1.msra.mxu0 %v2637_v13  ;;  %2161 = vmatpush3.msra.mxu1 %v2998_v54 }
 0x141   :  { %706 = vmatprep.subr.mxu0 %v2646_v15  ;;  %2162 = vmatprep.subr.mxu1 %v4058_v36 }
 0x142   :  { %707 = vmatpush1.msra.mxu0 %v2655_v17  ;;  %2163 = vmatpush3.msra.mxu1 %v3007_v56 }
 0x143   :  { %708 = vmatprep.subr.mxu0 %v2664_v19  ;;  %2164 = vmatprep.subr.mxu1 %v4058_v36 }
 0x144   :  { %709 = vmatpush1.msra.mxu0 %v2673_v21  ;;  %2165 = vmatpush3.msra.mxu1 %v3015_v58 }
 0x145   :  { %710 = vmatprep.subr.mxu0 %v2682_v23  ;;  %2166 = vmatprep.subr.mxu1 %v4058_v36 }
 0x146   :  { %711 = vmatpush1.msra.mxu0 %v2691_v25  ;;  %2167 = vmatpush3.msra.mxu1 %v3024_v60 }
 0x147   :  { %712 = vmatprep.subr.mxu0 %v2700_v27  ;;  %2168 = vmatprep.subr.mxu1 %v4058_v36 }
 0x148   :  { %713 = vmatpush1.msra.mxu0 %v2709_v29  ;;  %2169 = vmatpush3.msra.mxu1 %v3031_v62 }
 0x149   :  { %714 = vmatprep.subr.mxu0 %v2718_v31  ;;  %2170 = vmatprep.subr.mxu1 %v4058_v36 }
 0x14a   :  { %715 = vmatpush1.msra.mxu0 %v2727_v33  ;;  %2171 = vmatpush3.msra.mxu1 %v3040_v0 }
 0x14b   :  { %716 = vmatprep.subr.mxu0 %v2736_v35  ;;  %2172 = vmatprep.subr.mxu1 %v4058_v36 }
 0x14c   :  { %717 = vmatpush1.msra.mxu0 %v2745_v37  ;;  %2173 = vmatpush3.msra.mxu1 %v3049_v1 }
 0x14d   :  { %718 = vmatprep.subr.mxu0 %v2754_v39  ;;  %2174 = vmatprep.subr.mxu1 %v4058_v36 }
 0x14e   :  { %719 = vmatpush1.msra.mxu0 %v2763_v41  ;;  %2175 = vmatpush3.msra.mxu1 %v3058_v5 }
 0x14f   :  { %720 = vmatprep.subr.mxu0 %v2772_v43  ;;  %2176 = vmatprep.subr.mxu1 %v4058_v36 }
 0x150   :  { %721 = vmatpush1.msra.mxu0 %v2781_v45  ;;  %2177 = vmatpush3.msra.mxu1 %v3067_v7 }
 0x151   :  { %722 = vmatprep.subr.mxu0 %v2790_v47  ;;  %2178 = vmatprep.subr.mxu1 %v4058_v36 }
 0x152   :  { %723 = vmatpush1.msra.mxu0 %v2799_v49  ;;  %2179 = vmatpush3.msra.mxu1 %v3076_v9 }
 0x153   :  { %724 = vmatprep.subr.mxu0 %v2808_v51  ;;  %2180 = vmatprep.subr.mxu1 %v4058_v36 }
 0x154   :  { %725 = vmatpush1.msra.mxu0 %v2817_v53  ;;  %2181 = vmatpush3.msra.mxu1 %v3085_v12 }
 0x155   :  { %726 = vmatprep.subr.mxu0 %v2826_v55  ;;  %2182 = vmatprep.subr.mxu1 %v4058_v36 }
 0x156   :  { %727 = vmatpush1.msra.mxu0 %v2835_v57  ;;  %2183 = vmatpush3.msra.mxu1 %v3094_v14 }
 0x157   :  { %728 = vmatprep.subr.mxu0 %v2844_v59  ;;  %2184 = vmatprep.subr.mxu1 %v4058_v36 }
 0x158   :  { %729 = vmatpush1.msra.mxu0 %v4059_v20  ;;  %2185 = vmatpush3.msra.mxu1 %v4060_v30 }
 0x159   :  { %730 = vmatprep.subr.mxu0 %v4061_v42  ;;  %2186 = vmatprep.subr.mxu1 %v4058_v36 }
 0x15a   :  { %731 = vmatpush1.msra.mxu0 %v4062_v40  ;;  %764 = vmatprep.mubr.f32.mxu0 %v4058_v36 }
 0x15b   :  { %2187 = vmatpush3.msra.mxu1 %v4063_v38  ;;  %2188 = vmatprep.mubr.msk.f32.mxu1 %vm2542_vm0, %v4058_v36 }
 0x15c   :  { %864 = vmatprep.subr.mxu0 %v4064_v44  ;;  %2191 = vmatprep.subr.mxu1 %v4058_v36 }
 0x1fb   :  { %v602_v63 = vpop.f32.mrf.mxu0  ;;  %v673_v61 = vpop.f32.mrf.mxu1 }
 0x1fc   :  { %v677_v26 = vadd.f32 %v602_v63, %v4065_v34  ;;  %v691_v44 = vadd.f32 %v3201_v3, %v673_v61  ;;  %v3410_v61 = vld [vmem:[%s3995_s2 + $0x120] sm:$0xff] }
 0x1fd   :  { %v2155_v16 = vpop.f32.mrf.mxu1  ;;  %v604_v32 = vpop.f32.mrf.mxu0 }
 0x1fe   :  { %v1843_v2 = vmul.f32 -1.442695, %v677_v26  ;;  %v684_v46 = vadd.f32 %v604_v32, %v4066_v28  ;;  %v3417_v28 = vld [vmem:[%s3995_s2 + $0x110] sm:$0xff] }
 0x200   :  { %2422 = vpow2.f32 %v1843_v2  ;;  %v1844_v24 = vmul.f32 -1.442695, %v684_v46  ;;  %v3424_v46 = vld [vmem:[%s3995_s2 + $0x108] sm:$0xff] }
 0x202   :  { %2424 = vpow2.f32 %v1844_v24 }
 0x20d   :  { %v2423_v22 = vpop.eup %2422 }
 0x20e   :  { %v681_v18 = vadd.f32 1.0, %v2423_v22  ;;  %v3368_v22 = vld [vmem:[%s3995_s2 + $0x168] sm:$0xff] }
 0x20f   :  { %v2425_v38 = vpop.eup %2424 }
 0x210   :  { %2426 = vrcp.f32 %v681_v18  ;;  %v688_v40 = vadd.f32 1.0, %v2425_v38  ;;  %v3403_v38 = vld [vmem:[%s3995_s2 + $0x128] sm:$0xff] }
 0x212   :  { %2428 = vrcp.f32 %v688_v40  ;;  %v3396_v40 = vld [vmem:[%s3995_s2 + $0x138] sm:$0xff] }
 0x21d   :  { %v2427_v42 = vpop.eup %2426 }
 0x21e   :  { %v692_v30 = vmul.f32 %v2427_v42, %v691_v44  ;;  %v3389_v42 = vld [vmem:[%s3995_s2 + $0x140] sm:$0xff]  ;;  %v3431_v44 = vld [vmem:[%s3995_s2 + $0xf8] sm:$0xff] }
 0x21f   :  { %v2429_v34 = vpop.eup %2428 }
 0x220   :  { %v693_v63 = vadd.f32 %v692_v30, %v3184_v48  ;;  %v695_v26 = vsub.f32 1.0, %v2429_v34  ;;  %v697_v32 = vmul.f32 %v2429_v34, %v3204_v4  ;;  %v3382_v30 = vld [vmem:[%s3995_s2 + $0x150] sm:$0xff]  ;;  %v3445_v34 = vld [vmem:[%s3995_s2 + $0xe0] sm:$0xff] }
 0x222   :  { %2430 = vtanh.f32 %v693_v63  ;;  %v3438_v63 = vld [vmem:[%s3995_s2 + $0xf0] sm:$0xff] }
 0x22f   :  { %v2431_v16 = vpop.eup %2430 }
 0x230   :  { %v696_v2 = vmul.f32 %v2431_v16, %v695_v26  ;;  %v3452_v26 = vld [vmem:[%s3995_s2 + $0xd8] sm:$0xff]  ;;  %v3459_v16 = vld [vmem:[%s3995_s2 + $0xc8] sm:$0xff] }
 0x232   :  { %v3280_v24 = vadd.f32 %v697_v32, %v696_v2  ;;  %v3466_v2 = vld [vmem:[%s3995_s2 + $0xc0] sm:$0xff]  ;;  %v3473_v32 = vld [vmem:[%s3995_s2 + $0xb0] sm:$0xff] }
 0x234   :  { %4067 = vst [vmem:[#allocation4_spill] sm:$0xff] %v3280_v24  ;;  %765 = vmatmul.mubr.f32.vlgmr.msra.gmra.mxu0 %v3280_v24  ;;  %2189 = vmatmul.mubr.f32.vlgmr.msra.gmra.mxu1 %v3280_v24 }
 0x235   :  { %865 = vmatpush1.msra.mxu0 %v2605_v6  ;;  %2192 = vmatpush3.msra.mxu1 %v2981_v50  ;;  %v4068_v6 = vld [vmem:[#allocation7_spill] sm:$0xff] }
 0x236   :  { %866 = vmatprep.subr.mxu0 %v2614_v8  ;;  %2193 = vmatprep.subr.mxu1 %v4058_v36  ;;  %v4069_v8 = vld [vmem:[#allocation5_spill] sm:$0xff] }
 0x237   :  { %867 = vmatpush1.msra.mxu0 %v2623_v10  ;;  %2194 = vmatpush3.msra.mxu1 %v2990_v52  ;;  %v4070_v10 = vld [vmem:[#allocation6_spill] sm:$0xff] }
 0x238   :  { %868 = vmatprep.subr.mxu0 %v2628_v11  ;;  %2195 = vmatprep.subr.mxu1 %v4058_v36  ;;  %v4071_v11 = vld [vmem:[#allocation8_spill] sm:$0xff] }
 0x239   :  { %869 = vmatpush1.msra.mxu0 %v2637_v13  ;;  %2196 = vmatpush3.msra.mxu1 %v2998_v54  ;;  %v3352_v13 = vld [vmem:[%s3995_s2 + $0x170] sm:$0xff] }
 0x23a   :  { %870 = vmatprep.subr.mxu0 %v2646_v15  ;;  %2197 = vmatprep.subr.mxu1 %v4058_v36  ;;  %4072 = vst [vmem:[#allocation3_spill] sm:$0xff] %v3352_v13 }
 0x23b   :  { %871 = vmatpush1.msra.mxu0 %v2655_v17  ;;  %2198 = vmatpush3.msra.mxu1 %v3007_v56 }
 0x23c   :  { %872 = vmatprep.subr.mxu0 %v2664_v19  ;;  %2199 = vmatprep.subr.mxu1 %v4058_v36  ;;  %v4073_v19 = vld [vmem:[#allocation11_spill] sm:$0xff] }
 0x23d   :  { %873 = vmatpush1.msra.mxu0 %v2673_v21  ;;  %2200 = vmatpush3.msra.mxu1 %v3015_v58 }
 0x23e   :  { %874 = vmatprep.subr.mxu0 %v2682_v23  ;;  %2201 = vmatprep.subr.mxu1 %v4058_v36 }
 0x23f   :  { %875 = vmatpush1.msra.mxu0 %v2691_v25  ;;  %2202 = vmatpush3.msra.mxu1 %v3024_v60 }
 0x240   :  { %876 = vmatprep.subr.mxu0 %v2700_v27  ;;  %2203 = vmatprep.subr.mxu1 %v4058_v36 }
 0x241   :  { %877 = vmatpush1.msra.mxu0 %v2709_v29  ;;  %2204 = vmatpush3.msra.mxu1 %v3031_v62  ;;  %v4074_v29 = vld [vmem:[#allocation12_spill] sm:$0xff] }
 0x242   :  { %878 = vmatprep.subr.mxu0 %v2718_v31  ;;  %2205 = vmatprep.subr.mxu1 %v4058_v36 }
 0x243   :  { %879 = vmatpush1.msra.mxu0 %v2727_v33  ;;  %2206 = vmatpush3.msra.mxu1 %v3040_v0 }
 0x244   :  { %880 = vmatprep.subr.mxu0 %v2736_v35  ;;  %2207 = vmatprep.subr.mxu1 %v4058_v36 }
 0x245   :  { %881 = vmatpush1.msra.mxu0 %v2745_v37  ;;  %2208 = vmatpush3.msra.mxu1 %v3049_v1 }
 0x246   :  { %882 = vmatprep.subr.mxu0 %v2754_v39  ;;  %2209 = vmatprep.subr.mxu1 %v4058_v36 }
 0x247   :  { %883 = vmatpush1.msra.mxu0 %v2763_v41  ;;  %2210 = vmatpush3.msra.mxu1 %v3058_v5 }
 0x248   :  { %884 = vmatprep.subr.mxu0 %v2772_v43  ;;  %2211 = vmatprep.subr.mxu1 %v4058_v36 }
 0x249   :  { %885 = vmatpush1.msra.mxu0 %v2781_v45  ;;  %2212 = vmatpush3.msra.mxu1 %v3067_v7 }
 0x24a   :  { %886 = vmatprep.subr.mxu0 %v2790_v47  ;;  %2213 = vmatprep.subr.mxu1 %v4058_v36 }
 0x24b   :  { %887 = vmatpush1.msra.mxu0 %v2799_v49  ;;  %2214 = vmatpush3.msra.mxu1 %v3076_v9  ;;  %v4075_v49 = vld [vmem:[#allocation24_spill] sm:$0xff] }
 0x24c   :  { %888 = vmatprep.subr.mxu0 %v2808_v51  ;;  %2215 = vmatprep.subr.mxu1 %v4058_v36 }
 0x24d   :  { %889 = vmatpush1.msra.mxu0 %v2817_v53  ;;  %2216 = vmatpush3.msra.mxu1 %v3085_v12 }
 0x24e   :  { %890 = vmatprep.subr.mxu0 %v2826_v55  ;;  %2217 = vmatprep.subr.mxu1 %v4058_v36 }
 0x24f   :  { %891 = vmatpush1.msra.mxu0 %v2835_v57  ;;  %2218 = vmatpush3.msra.mxu1 %v3094_v14 }
 0x250   :  { %892 = vmatprep.subr.mxu0 %v2844_v59  ;;  %2219 = vmatprep.subr.mxu1 %v4058_v36 }
 0x251   :  { %893 = vmatpush1.msra.mxu0 %v4059_v20  ;;  %2220 = vmatpush3.msra.mxu1 %v4068_v6  ;;  %v3375_v20 = vld [vmem:[%s3995_s2 + $0x158] sm:$0xff] }
 0x252   :  { %894 = vmatprep.subr.mxu0 %v4069_v8  ;;  %2221 = vmatprep.subr.mxu1 %v4058_v36  ;;  %v3480_v8 = vld [vmem:[%s3995_s2 + $0xa8] sm:$0xff] }
 0x253   :  { %895 = vmatpush1.msra.mxu0 %v4070_v10  ;;  %928 = vmatprep.mubr.f32.mxu0 %v4058_v36  ;;  %v3487_v10 = vld [vmem:[%s3995_s2 + $0x98] sm:$0xff] }
 0x254   :  { %2222 = vmatpush3.msra.mxu1 %v4071_v11  ;;  %2223 = vmatprep.mubr.msk.f32.mxu1 %vm2542_vm0, %v4058_v36 }
 0x255   :  { %1028 = vmatprep.subr.mxu0 %v3352_v13  ;;  %2226 = vmatprep.subr.mxu1 %v4058_v36 }
 0x2f4   :  { %v766_v15 = vpop.f32.mrf.mxu0  ;;  %v837_v17 = vpop.f32.mrf.mxu1 }
 0x2f5   :  { %v841_v21 = vadd.f32 %v766_v15, %v4073_v19  ;;  %v855_v43 = vadd.f32 %v3201_v3, %v837_v17  ;;  %v3494_v15 = vld [vmem:[%s3995_s2 + $0x90] sm:$0xff]  ;;  %v3501_v17 = vld [vmem:[%s3995_s2 + $0x80] sm:$0xff]  ;;  %v3508_v19 = vld [vmem:[%s3995_s2 + $0x78] sm:$0xff] }
 0x2f6   :  { %v2190_v23 = vpop.f32.mrf.mxu1  ;;  %v768_v27 = vpop.f32.mrf.mxu0 }
 0x2f7   :  { %v1845_v25 = vmul.f32 -1.442695, %v841_v21  ;;  %v848_v31 = vadd.f32 %v768_v27, %v4074_v29  ;;  %v3515_v21 = vld [vmem:[%s3995_s2 + $0x68] sm:$0xff]  ;;  %v3522_v23 = vld [vmem:[%s3995_s2 + $0x60] sm:$0xff]  ;;  %v3543_v29 = vld [vmem:[%s3995_s2 + $0x38] sm:$0xff] }
 0x2f8   :  { %v3536_v27 = vld [vmem:[%s3995_s2 + $0x48] sm:$0xff] }
 0x2f9   :  { %2432 = vpow2.f32 %v1845_v25  ;;  %v1846_v33 = vmul.f32 -1.442695, %v848_v31  ;;  %v3529_v25 = vld [vmem:[%s3995_s2 + $0x50] sm:$0xff] }
 0x2fa   :  { %v3550_v31 = vld [vmem:[%s3995_s2 + $0x30] sm:$0xff] }
 0x2fb   :  { %2434 = vpow2.f32 %v1846_v33  ;;  %v3557_v33 = vld [vmem:[%s3995_s2 + $0x20] sm:$0xff] }
 0x306   :  { %v2433_v35 = vpop.eup %2432 }
 0x307   :  { %v845_v37 = vadd.f32 1.0, %v2433_v35  ;;  %v3564_v35 = vld [vmem:[%s3995_s2 + $0x18] sm:$0xff] }
 0x308   :  { %v2435_v39 = vpop.eup %2434 }
 0x309   :  { %2436 = vrcp.f32 %v845_v37  ;;  %v852_v41 = vadd.f32 1.0, %v2435_v39  ;;  %v3571_v37 = vld [vmem:[%s3995_s2 + $0x8] sm:$0xff]  ;;  %v3578_v39 = vld [vmem:[%s3995_s2] sm:$0xff] }
 0x30a   :  { %4077 = vst [vmem:[#allocation10_spill] sm:$0xff] %v3571_v37  ;;  %4078 = vst [vmem:[#allocation5_spill] sm:$0xff] %v3578_v39 }
 0x30b   :  { %2438 = vrcp.f32 %v852_v41 }
 0x316   :  { %v2437_v45 = vpop.eup %2436 }
 0x317   :  { %v856_v47 = vmul.f32 %v2437_v45, %v855_v43  ;;  %v4079_v45 = vld [vmem:[#allocation13_spill] sm:$0xff] }
 0x318   :  { %v2439_v53 = vpop.eup %2438 }
 0x319   :  { %v857_v51 = vadd.f32 %v856_v47, %v4075_v49  ;;  %v859_v55 = vsub.f32 1.0, %v2439_v53  ;;  %v861_v18 = vmul.f32 %v2439_v53, %v3280_v24 }
 0x31b   :  { %2440 = vtanh.f32 %v857_v51 }
 0x328   :  { %v2441_v57 = vpop.eup %2440 }
 0x329   :  { %v860_v59 = vmul.f32 %v2441_v57, %v859_v55  ;;  %v4080_v55 = vld [vmem:[#allocation14_spill] sm:$0xff] }
 0x32b   :  { %v3361_v48 = vadd.f32 %v861_v18, %v860_v59 }
 0x32d   :  { %4076 = vst [vmem:[#allocation9_spill] sm:$0xff] %v3361_v48  ;;  %929 = vmatmul.mubr.f32.vlgmr.msra.gmra.mxu0 %v3361_v48  ;;  %2224 = vmatmul.mubr.f32.vlgmr.msra.gmra.mxu1 %v3361_v48 }
 0x32e   :  { %1029 = vmatpush1.msra.mxu0 %v3368_v22  ;;  %2227 = vmatpush3.msra.mxu1 %v2981_v50 }
 0x32f   :  { %1030 = vmatprep.subr.mxu0 %v3375_v20  ;;  %2228 = vmatprep.subr.mxu1 %v4058_v36 }
 0x330   :  { %1031 = vmatpush1.msra.mxu0 %v3382_v30  ;;  %2229 = vmatpush3.msra.mxu1 %v2990_v52 }
 0x331   :  { %1032 = vmatprep.subr.mxu0 %v3389_v42  ;;  %2230 = vmatprep.subr.mxu1 %v4058_v36 }
 0x332   :  { %1033 = vmatpush1.msra.mxu0 %v3396_v40  ;;  %2231 = vmatpush3.msra.mxu1 %v2998_v54 }
 0x333   :  { %1034 = vmatprep.subr.mxu0 %v3403_v38  ;;  %2232 = vmatprep.subr.mxu1 %v4058_v36 }
 0x334   :  { %1035 = vmatpush1.msra.mxu0 %v3410_v61  ;;  %2233 = vmatpush3.msra.mxu1 %v3007_v56 }
 0x335   :  { %1036 = vmatprep.subr.mxu0 %v3417_v28  ;;  %2234 = vmatprep.subr.mxu1 %v4058_v36 }
 0x336   :  { %1037 = vmatpush1.msra.mxu0 %v3424_v46  ;;  %2235 = vmatpush3.msra.mxu1 %v3015_v58 }
 0x337   :  { %1038 = vmatprep.subr.mxu0 %v3431_v44  ;;  %2236 = vmatprep.subr.mxu1 %v4058_v36 }
 0x338   :  { %1039 = vmatpush1.msra.mxu0 %v3438_v63  ;;  %2237 = vmatpush3.msra.mxu1 %v3024_v60 }
 0x339   :  { %1040 = vmatprep.subr.mxu0 %v3445_v34  ;;  %2238 = vmatprep.subr.mxu1 %v4058_v36 }
 0x33a   :  { %1041 = vmatpush1.msra.mxu0 %v3452_v26  ;;  %2239 = vmatpush3.msra.mxu1 %v3031_v62 }
 0x33b   :  { %1042 = vmatprep.subr.mxu0 %v3459_v16  ;;  %2240 = vmatprep.subr.mxu1 %v4058_v36 }
 0x33c   :  { %1043 = vmatpush1.msra.mxu0 %v3466_v2  ;;  %2241 = vmatpush3.msra.mxu1 %v3040_v0 }
 0x33d   :  { %1044 = vmatprep.subr.mxu0 %v3473_v32  ;;  %2242 = vmatprep.subr.mxu1 %v4058_v36 }
 0x33e   :  { %1045 = vmatpush1.msra.mxu0 %v3480_v8  ;;  %2243 = vmatpush3.msra.mxu1 %v3049_v1 }
 0x33f   :  { %1046 = vmatprep.subr.mxu0 %v3487_v10  ;;  %2244 = vmatprep.subr.mxu1 %v4058_v36 }
 0x340   :  { %1047 = vmatpush1.msra.mxu0 %v3494_v15  ;;  %2245 = vmatpush3.msra.mxu1 %v3058_v5 }
 0x341   :  { %1048 = vmatprep.subr.mxu0 %v3501_v17  ;;  %2246 = vmatprep.subr.mxu1 %v4058_v36 }
 0x342   :  { %1049 = vmatpush1.msra.mxu0 %v3508_v19  ;;  %2247 = vmatpush3.msra.mxu1 %v3067_v7 }
 0x343   :  { %1050 = vmatprep.subr.mxu0 %v3515_v21  ;;  %2248 = vmatprep.subr.mxu1 %v4058_v36 }
 0x344   :  { %1051 = vmatpush1.msra.mxu0 %v3522_v23  ;;  %2249 = vmatpush3.msra.mxu1 %v3076_v9 }
 0x345   :  { %1052 = vmatprep.subr.mxu0 %v3529_v25  ;;  %2250 = vmatprep.subr.mxu1 %v4058_v36 }
 0x346   :  { %1053 = vmatpush1.msra.mxu0 %v3536_v27  ;;  %2251 = vmatpush3.msra.mxu1 %v3085_v12 }
 0x347   :  { %1054 = vmatprep.subr.mxu0 %v3543_v29  ;;  %2252 = vmatprep.subr.mxu1 %v4058_v36 }
 0x348   :  { %1055 = vmatpush1.msra.mxu0 %v3550_v31  ;;  %2253 = vmatpush3.msra.mxu1 %v3094_v14 }
 0x349   :  { %1056 = vmatprep.subr.mxu0 %v3557_v33  ;;  %2254 = vmatprep.subr.mxu1 %v4058_v36 }
 0x34a   :  { %1057 = vmatpush1.msra.mxu0 %v3564_v35  ;;  %2255 = vmatpush3.msra.mxu1 %v4068_v6  ;;  %v4081_v6 = vld [vmem:[#allocation23_spill] sm:$0xff] }
 0x34b   :  { %1058 = vmatprep.subr.mxu0 %v3571_v37  ;;  %2256 = vmatprep.subr.mxu1 %v4058_v36 }
 0x34c   :  { %1059 = vmatpush1.msra.mxu0 %v3578_v39  ;;  %1092 = vmatprep.mubr.f32.mxu0 %v4058_v36 }
 0x34d   :  { %2257 = vmatpush3.msra.mxu1 %v4071_v11  ;;  %2258 = vmatprep.mubr.msk.f32.mxu1 %vm2542_vm0, %v4058_v36 }
 0x34e   :  { %1192 = vmatprep.subr.mxu0 %v3352_v13  ;;  %2261 = vmatprep.subr.mxu1 %v4058_v36 }
 0x3ed   :  { %v930_v41 = vpop.f32.mrf.mxu0  ;;  %v1001_v43 = vpop.f32.mrf.mxu1 }
 0x3ee   :  { %v1005_v47 = vadd.f32 %v930_v41, %v4079_v45  ;;  %v1019_v13 = vadd.f32 %v3201_v3, %v1001_v43 }
 0x3ef   :  { %v2225_v49 = vpop.f32.mrf.mxu1  ;;  %v932_v53 = vpop.f32.mrf.mxu0 }
 0x3f0   :  { %v1847_v51 = vmul.f32 -1.442695, %v1005_v47  ;;  %v1012_v57 = vadd.f32 %v932_v53, %v4080_v55 }
 0x3f2   :  { %2442 = vpow2.f32 %v1847_v51  ;;  %v1848_v59 = vmul.f32 -1.442695, %v1012_v57  ;;  %v4090_v57 = vld [vmem:[#allocation26_spill] sm:$0xff] }
 0x3f4   :  { %2444 = vpow2.f32 %v1848_v59 }
 0x3ff   :  { %v2443_v18 = vpop.eup %2442 }
 0x400   :  { %v1009_v24 = vadd.f32 1.0, %v2443_v18 }
 0x401   :  { %v2445_v4 = vpop.eup %2444 }
 0x402   :  { %2446 = vrcp.f32 %v1009_v24  ;;  %v1016_v11 = vadd.f32 1.0, %v2445_v4 }
 0x404   :  { %2448 = vrcp.f32 %v1016_v11 }
 0x40f   :  { %v2447_v39 = vpop.eup %2446 }
 0x410   :  { %v1020_v37 = vmul.f32 %v2447_v39, %v1019_v13 }
 0x411   :  { %v2449_v45 = vpop.eup %2448 }
 0x412   :  { %v1021_v41 = vadd.f32 %v1020_v37, %v4081_v6  ;;  %v1023_v47 = vsub.f32 1.0, %v2449_v45  ;;  %v1025_v53 = vmul.f32 %v2449_v45, %v3361_v48 }
 0x414   :  { %2450 = vtanh.f32 %v1021_v41 }
 0x421   :  { %v2451_v49 = vpop.eup %2450 }
 0x422   :  { %v1024_v51 = vmul.f32 %v2451_v49, %v1023_v47 }
 0x424   :  { %v3592_v55 = vadd.f32 %v1025_v53, %v1024_v51  ;;  %v3676_v53 = vld [vmem:[%s3995_s2 + $0x178] sm:$0xff] }
 0x426   :  { %4082 = vst [vmem:[#allocation6_spill] sm:$0xff] %v3592_v55  ;;  %1093 = vmatmul.mubr.f32.vlgmr.msra.gmra.mxu0 %v3592_v55  ;;  %2259 = vmatmul.mubr.f32.vlgmr.msra.gmra.mxu1 %v3592_v55 }
 0x427   :  { %1193 = vmatpush1.msra.mxu0 %v3368_v22  ;;  %2262 = vmatpush3.msra.mxu1 %v2981_v50  ;;  %v4083_v50 = vld [vmem:[#allocation7_spill] sm:$0xff] }
 0x428   :  { %1194 = vmatprep.subr.mxu0 %v3375_v20  ;;  %2263 = vmatprep.subr.mxu1 %v4058_v36 }
 0x429   :  { %1195 = vmatpush1.msra.mxu0 %v3382_v30  ;;  %2264 = vmatpush3.msra.mxu1 %v2990_v52  ;;  %v4084_v52 = vld [vmem:[#allocation10_spill] sm:$0xff] }
 0x42a   :  { %1196 = vmatprep.subr.mxu0 %v3389_v42  ;;  %2265 = vmatprep.subr.mxu1 %v4058_v36 }
 0x42b   :  { %1197 = vmatpush1.msra.mxu0 %v3396_v40  ;;  %2266 = vmatpush3.msra.mxu1 %v2998_v54  ;;  %v4085_v54 = vld [vmem:[#allocation5_spill] sm:$0xff] }
 0x42c   :  { %1198 = vmatprep.subr.mxu0 %v3403_v38  ;;  %2267 = vmatprep.subr.mxu1 %v4058_v36 }
 0x42d   :  { %1199 = vmatpush1.msra.mxu0 %v3410_v61  ;;  %2268 = vmatpush3.msra.mxu1 %v3007_v56  ;;  %v4086_v56 = vld [vmem:[#allocation8_spill] sm:$0xff] }
 0x42e   :  { %1200 = vmatprep.subr.mxu0 %v3417_v28  ;;  %2269 = vmatprep.subr.mxu1 %v4058_v36 }
 0x42f   :  { %1201 = vmatpush1.msra.mxu0 %v3424_v46  ;;  %2270 = vmatpush3.msra.mxu1 %v3015_v58  ;;  %v4087_v58 = vld [vmem:[#allocation3_spill] sm:$0xff] }
 0x430   :  { %1202 = vmatprep.subr.mxu0 %v3431_v44  ;;  %2271 = vmatprep.subr.mxu1 %v4058_v36 }
 0x431   :  { %1203 = vmatpush1.msra.mxu0 %v3438_v63  ;;  %2272 = vmatpush3.msra.mxu1 %v3024_v60 }
 0x432   :  { %1204 = vmatprep.subr.mxu0 %v3445_v34  ;;  %2273 = vmatprep.subr.mxu1 %v4058_v36 }
 0x433   :  { %1205 = vmatpush1.msra.mxu0 %v3452_v26  ;;  %2274 = vmatpush3.msra.mxu1 %v3031_v62 }
 0x434   :  { %1206 = vmatprep.subr.mxu0 %v3459_v16  ;;  %2275 = vmatprep.subr.mxu1 %v4058_v36 }
 0x435   :  { %1207 = vmatpush1.msra.mxu0 %v3466_v2  ;;  %2276 = vmatpush3.msra.mxu1 %v3040_v0  ;;  %v4088_v0 = vld [vmem:[#allocation15_spill] sm:$0xff] }
 0x436   :  { %1208 = vmatprep.subr.mxu0 %v3473_v32  ;;  %2277 = vmatprep.subr.mxu1 %v4058_v36 }
 0x437   :  { %1209 = vmatpush1.msra.mxu0 %v3480_v8  ;;  %2278 = vmatpush3.msra.mxu1 %v3049_v1 }
 0x438   :  { %1210 = vmatprep.subr.mxu0 %v3487_v10  ;;  %2279 = vmatprep.subr.mxu1 %v4058_v36 }
 0x439   :  { %1211 = vmatpush1.msra.mxu0 %v3494_v15  ;;  %2280 = vmatpush3.msra.mxu1 %v3058_v5 }
 0x43a   :  { %1212 = vmatprep.subr.mxu0 %v3501_v17  ;;  %2281 = vmatprep.subr.mxu1 %v4058_v36 }
 0x43b   :  { %1213 = vmatpush1.msra.mxu0 %v3508_v19  ;;  %2282 = vmatpush3.msra.mxu1 %v3067_v7 }
 0x43c   :  { %1214 = vmatprep.subr.mxu0 %v3515_v21  ;;  %2283 = vmatprep.subr.mxu1 %v4058_v36 }
 0x43d   :  { %1215 = vmatpush1.msra.mxu0 %v3522_v23  ;;  %2284 = vmatpush3.msra.mxu1 %v3076_v9 }
 0x43e   :  { %1216 = vmatprep.subr.mxu0 %v3529_v25  ;;  %2285 = vmatprep.subr.mxu1 %v4058_v36 }
 0x43f   :  { %1217 = vmatpush1.msra.mxu0 %v3536_v27  ;;  %2286 = vmatpush3.msra.mxu1 %v3085_v12  ;;  %v4089_v12 = vld [vmem:[#allocation16_spill] sm:$0xff] }
 0x440   :  { %1218 = vmatprep.subr.mxu0 %v3543_v29  ;;  %2287 = vmatprep.subr.mxu1 %v4058_v36 }
 0x441   :  { %1219 = vmatpush1.msra.mxu0 %v3550_v31  ;;  %2288 = vmatpush3.msra.mxu1 %v3094_v14 }
 0x442   :  { %1220 = vmatprep.subr.mxu0 %v3557_v33  ;;  %2289 = vmatprep.subr.mxu1 %v4058_v36 }
 0x443   :  { %1221 = vmatpush1.msra.mxu0 %v3564_v35  ;;  %2290 = vmatpush3.msra.mxu1 %v4083_v50  ;;  %v3685_v50 = vld [vmem:[%s3995_s2 + $0x160] sm:$0xff] }
 0x444   :  { %1222 = vmatprep.subr.mxu0 %v4084_v52  ;;  %2291 = vmatprep.subr.mxu1 %v4058_v36 }
 0x445   :  { %1223 = vmatpush1.msra.mxu0 %v4085_v54  ;;  %1256 = vmatprep.mubr.f32.mxu0 %v4058_v36 }
 0x446   :  { %2292 = vmatpush3.msra.mxu1 %v4086_v56  ;;  %2293 = vmatprep.mubr.msk.f32.mxu1 %vm2542_vm0, %v4058_v36  ;;  %v3694_v56 = vld [vmem:[%s3995_s2 + $0x148] sm:$0xff] }
 0x447   :  { %1356 = vmatprep.subr.mxu0 %v4087_v58  ;;  %2296 = vmatprep.subr.mxu1 %v4058_v36 }
 0x4e6   :  { %v1094_v60 = vpop.f32.mrf.mxu0  ;;  %v1165_v62 = vpop.f32.mrf.mxu1 }
 0x4e7   :  { %v1169_v1 = vadd.f32 %v1094_v60, %v4088_v0  ;;  %v1183_v37 = vadd.f32 %v3201_v3, %v1165_v62  ;;  %v3703_v60 = vld [vmem:[%s3995_s2 + $0x130] sm:$0xff]  ;;  %v3712_v62 = vld [vmem:[%s3995_s2 + $0x118] sm:$0xff]  ;;  %v3721_v0 = vld [vmem:[%s3995_s2 + $0x100] sm:$0xff] }
 0x4e8   :  { %v2260_v5 = vpop.f32.mrf.mxu1  ;;  %v1096_v9 = vpop.f32.mrf.mxu0 }
 0x4e9   :  { %v1849_v7 = vmul.f32 -1.442695, %v1169_v1  ;;  %v1176_v14 = vadd.f32 %v1096_v9, %v4089_v12  ;;  %v3730_v1 = vld [vmem:[%s3995_s2 + $0xe8] sm:$0xff]  ;;  %v3739_v5 = vld [vmem:[%s3995_s2 + $0xd0] sm:$0xff]  ;;  %v3757_v9 = vld [vmem:[%s3995_s2 + $0xa0] sm:$0xff] }
 0x4ea   :  { %v3766_v12 = vld [vmem:[%s3995_s2 + $0x88] sm:$0xff] }
 0x4eb   :  { %2452 = vpow2.f32 %v1849_v7  ;;  %v1850_v4 = vmul.f32 -1.442695, %v1176_v14  ;;  %v3748_v7 = vld [vmem:[%s3995_s2 + $0xb8] sm:$0xff]  ;;  %v3775_v14 = vld [vmem:[%s3995_s2 + $0x70] sm:$0xff] }
 0x4ed   :  { %2454 = vpow2.f32 %v1850_v4  ;;  %v3784_v4 = vld [vmem:[%s3995_s2 + $0x58] sm:$0xff] }
 0x4f8   :  { %v2453_v24 = vpop.eup %2452 }
 0x4f9   :  { %v1173_v6 = vadd.f32 1.0, %v2453_v24  ;;  %v3793_v24 = vld [vmem:[%s3995_s2 + $0x40] sm:$0xff] }
 0x4fa   :  { %v2455_v11 = vpop.eup %2454 }
 0x4fb   :  { %2456 = vrcp.f32 %v1173_v6  ;;  %v1180_v13 = vadd.f32 1.0, %v2455_v11  ;;  %v3802_v6 = vld [vmem:[%s3995_s2 + $0x28] sm:$0xff]  ;;  %v3812_v11 = vld [vmem:[%s3995_s2 + $0x10] sm:$0xff] }
 0x4fc   :  { %4091 = vst [vmem:[#allocation11_spill] sm:$0xff] %v3802_v6  ;;  %4092 = vst [vmem:[#allocation12_spill] sm:$0xff] %v3812_v11 }
 0x4fd   :  { %2458 = vrcp.f32 %v1180_v13 }
 0x508   :  { %v2457_v39 = vpop.eup %2456 }
 0x509   :  { %v1184_v43 = vmul.f32 %v2457_v39, %v1183_v37  ;;  %v4093_v39 = vld [vmem:[#allocation17_spill] sm:$0xff] }
 0x50a   :  { %v2459_v18 = vpop.eup %2458 }
 0x50b   :  { %v1185_v59 = vadd.f32 %v1184_v43, %v4090_v57  ;;  %v1187_v41 = vsub.f32 1.0, %v2459_v18  ;;  %v1189_v49 = vmul.f32 %v2459_v18, %v3592_v55 }
 0x50d   :  { %2460 = vtanh.f32 %v1185_v59 }
 0x51a   :  { %v2461_v45 = vpop.eup %2460 }
 0x51b   :  { %v1188_v47 = vmul.f32 %v2461_v45, %v1187_v41  ;;  %v4094_v41 = vld [vmem:[#allocation18_spill] sm:$0xff] }
 0x51d   :  { %v3668_v51 = vadd.f32 %v1189_v49, %v1188_v47 }
 0x51f   :  { %1257 = vmatmul.mubr.f32.vlgmr.msra.gmra.mxu0 %v3668_v51  ;;  %2294 = vmatmul.mubr.f32.vlgmr.msra.gmra.mxu1 %v3668_v51 }
 0x520   :  { %1357 = vmatpush1.msra.mxu0 %v3368_v22  ;;  %2297 = vmatpush3.msra.mxu1 %v3676_v53 }
 0x521   :  { %1358 = vmatprep.subr.mxu0 %v3375_v20  ;;  %2298 = vmatprep.subr.mxu1 %v4058_v36 }
 0x522   :  { %1359 = vmatpush1.msra.mxu0 %v3382_v30  ;;  %2299 = vmatpush3.msra.mxu1 %v3685_v50 }
 0x523   :  { %1360 = vmatprep.subr.mxu0 %v3389_v42  ;;  %2300 = vmatprep.subr.mxu1 %v4058_v36 }
 0x524   :  { %1361 = vmatpush1.msra.mxu0 %v3396_v40  ;;  %2301 = vmatpush3.msra.mxu1 %v3694_v56 }
 0x525   :  { %1362 = vmatprep.subr.mxu0 %v3403_v38  ;;  %2302 = vmatprep.subr.mxu1 %v4058_v36 }
 0x526   :  { %1363 = vmatpush1.msra.mxu0 %v3410_v61  ;;  %2303 = vmatpush3.msra.mxu1 %v3703_v60 }
 0x527   :  { %1364 = vmatprep.subr.mxu0 %v3417_v28  ;;  %2304 = vmatprep.subr.mxu1 %v4058_v36 }
 0x528   :  { %1365 = vmatpush1.msra.mxu0 %v3424_v46  ;;  %2305 = vmatpush3.msra.mxu1 %v3712_v62 }
 0x529   :  { %1366 = vmatprep.subr.mxu0 %v3431_v44  ;;  %2306 = vmatprep.subr.mxu1 %v4058_v36 }
 0x52a   :  { %1367 = vmatpush1.msra.mxu0 %v3438_v63  ;;  %2307 = vmatpush3.msra.mxu1 %v3721_v0 }
 0x52b   :  { %1368 = vmatprep.subr.mxu0 %v3445_v34  ;;  %2308 = vmatprep.subr.mxu1 %v4058_v36 }
 0x52c   :  { %1369 = vmatpush1.msra.mxu0 %v3452_v26  ;;  %2309 = vmatpush3.msra.mxu1 %v3730_v1 }
 0x52d   :  { %1370 = vmatprep.subr.mxu0 %v3459_v16  ;;  %2310 = vmatprep.subr.mxu1 %v4058_v36 }
 0x52e   :  { %1371 = vmatpush1.msra.mxu0 %v3466_v2  ;;  %2311 = vmatpush3.msra.mxu1 %v3739_v5 }
 0x52f   :  { %1372 = vmatprep.subr.mxu0 %v3473_v32  ;;  %2312 = vmatprep.subr.mxu1 %v4058_v36 }
 0x530   :  { %1373 = vmatpush1.msra.mxu0 %v3480_v8  ;;  %2313 = vmatpush3.msra.mxu1 %v3748_v7 }
 0x531   :  { %1374 = vmatprep.subr.mxu0 %v3487_v10  ;;  %2314 = vmatprep.subr.mxu1 %v4058_v36 }
 0x532   :  { %1375 = vmatpush1.msra.mxu0 %v3494_v15  ;;  %2315 = vmatpush3.msra.mxu1 %v3757_v9 }
 0x533   :  { %1376 = vmatprep.subr.mxu0 %v3501_v17  ;;  %2316 = vmatprep.subr.mxu1 %v4058_v36 }
 0x534   :  { %1377 = vmatpush1.msra.mxu0 %v3508_v19  ;;  %2317 = vmatpush3.msra.mxu1 %v3766_v12 }
 0x535   :  { %1378 = vmatprep.subr.mxu0 %v3515_v21  ;;  %2318 = vmatprep.subr.mxu1 %v4058_v36 }
 0x536   :  { %1379 = vmatpush1.msra.mxu0 %v3522_v23  ;;  %2319 = vmatpush3.msra.mxu1 %v3775_v14 }
 0x537   :  { %1380 = vmatprep.subr.mxu0 %v3529_v25  ;;  %2320 = vmatprep.subr.mxu1 %v4058_v36 }
 0x538   :  { %1381 = vmatpush1.msra.mxu0 %v3536_v27  ;;  %2321 = vmatpush3.msra.mxu1 %v3784_v4 }
 0x539   :  { %1382 = vmatprep.subr.mxu0 %v3543_v29  ;;  %2322 = vmatprep.subr.mxu1 %v4058_v36 }
 0x53a   :  { %1383 = vmatpush1.msra.mxu0 %v3550_v31  ;;  %2323 = vmatpush3.msra.mxu1 %v3793_v24 }
 0x53b   :  { %1384 = vmatprep.subr.mxu0 %v3557_v33  ;;  %2324 = vmatprep.subr.mxu1 %v4058_v36 }
 0x53c   :  { %1385 = vmatpush1.msra.mxu0 %v3564_v35  ;;  %2325 = vmatpush3.msra.mxu1 %v3802_v6  ;;  %v4095_v6 = vld [vmem:[#allocation25_spill] sm:$0xff] }
 0x53d   :  { %1386 = vmatprep.subr.mxu0 %v4084_v52  ;;  %2326 = vmatprep.subr.mxu1 %v4058_v36 }
 0x53e   :  { %1387 = vmatpush1.msra.mxu0 %v4085_v54  ;;  %1420 = vmatprep.mubr.f32.mxu0 %v4058_v36 }
 0x53f   :  { %2327 = vmatpush3.msra.mxu1 %v3812_v11  ;;  %2328 = vmatprep.mubr.msk.f32.mxu1 %vm2542_vm0, %v4058_v36 }
 0x540   :  { %1520 = vmatprep.subr.mxu0 %v4087_v58  ;;  %2331 = vmatprep.subr.mxu1 %v4058_v36 }
 0x5df   :  { %v1258_v13 = vpop.f32.mrf.mxu0  ;;  %v1329_v37 = vpop.f32.mrf.mxu1 }
 0x5e0   :  { %v1333_v43 = vadd.f32 %v1258_v13, %v4093_v39  ;;  %v1347_v58 = vadd.f32 %v3201_v3, %v1329_v37  ;;  %v4096_v3 = vld [vmem:[#allocation11_spill] sm:$0xff] }
 0x5e1   :  { %v2295_v57 = vpop.f32.mrf.mxu1  ;;  %v1260_v18 = vpop.f32.mrf.mxu0 }
 0x5e2   :  { %v1851_v59 = vmul.f32 -1.442695, %v1333_v43  ;;  %v1340_v45 = vadd.f32 %v1260_v18, %v4094_v41 }
 0x5e4   :  { %2462 = vpow2.f32 %v1851_v59  ;;  %v1852_v47 = vmul.f32 -1.442695, %v1340_v45  ;;  %v4106_v45 = vld [vmem:[#allocation6_spill] sm:$0xff] }
 0x5e6   :  { %2464 = vpow2.f32 %v1852_v47  ;;  %v1695_v47 = vmax.f32 %v4106_v45, 0.0 }
 0x5f1   :  { %v2463_v49 = vpop.eup %2462 }
 0x5f2   :  { %v1337_v55 = vadd.f32 1.0, %v2463_v49  ;;  %v1696_v49 = vmax.f32 %v3668_v51, 0.0 }
 0x5f3   :  { %v2465_v48 = vpop.eup %2464 }
 0x5f4   :  { %2466 = vrcp.f32 %v1337_v55  ;;  %v1344_v11 = vadd.f32 1.0, %v2465_v48  ;;  %v4097_v48 = vld [vmem:[#allocation10_spill] sm:$0xff]  ;;  %v4103_v55 = vld [vmem:[#allocation29_spill] sm:$0xff] }
 0x5f6   :  { %2468 = vrcp.f32 %v1344_v11  ;;  %v4105_v11 = vld [vmem:[#allocation9_spill] sm:$0xff] }
 0x5f7   :  { %v1694_v37 = vmax.f32 %v4105_v11, 0.0 }
 0x601   :  { %v2467_v54 = vpop.eup %2466 }
 0x602   :  { %v1348_v52 = vmul.f32 %v2467_v54, %v1347_v58  ;;  %v1713_v54 = vld [vmem:[%s3999_s5 + $0x68] sm:$0xff] }
 0x603   :  { %v2469_v39 = vpop.eup %2468 }
 0x604   :  { %v1349_v13 = vadd.f32 %v1348_v52, %v4095_v6  ;;  %v1351_v43 = vsub.f32 1.0, %v2469_v39  ;;  %v1353_v18 = vmul.f32 %v2469_v39, %v3668_v51  ;;  %v1692_v52 = vmax.f32 %v4103_v55, 0.0 }
 0x606   :  { %2470 = vtanh.f32 %v1349_v13 }
 0x613   :  { %v2471_v57 = vpop.eup %2470 }
 0x614   :  { %v1352_v59 = vmul.f32 %v2471_v57, %v1351_v43  ;;  %v4107_v57 = vld [vmem:[#allocation21_spill] sm:$0xff] }
 0x616   :  { %v3824_v41 = vadd.f32 %v1353_v18, %v1352_v59 }
 0x618   :  { %1421 = vmatmul.mubr.f32.vlgmr.msra.gmra.mxu0 %v3824_v41  ;;  %2329 = vmatmul.mubr.f32.vlgmr.msra.gmra.mxu1 %v3824_v41  ;;  %v1697_v58 = vmax.f32 %v3824_v41, 0.0 }
 0x619   :  { %1521 = vmatpush1.msra.mxu0 %v3368_v22  ;;  %2332 = vmatpush3.msra.mxu1 %v3676_v53  ;;  %v4098_v22 = vld [vmem:[#allocation5_spill] sm:$0xff]  ;;  %v1712_v53 = vld [vmem:[%s3999_s5 + $0x60] sm:$0xff] }
 0x61a   :  { %1522 = vmatprep.subr.mxu0 %v3375_v20  ;;  %2333 = vmatprep.subr.mxu1 %v4058_v36  ;;  %v4099_v20 = vld [vmem:[#allocation12_spill] sm:$0xff] }
 0x61b   :  { %1523 = vmatpush1.msra.mxu0 %v3382_v30  ;;  %2334 = vmatpush3.msra.mxu1 %v3685_v50  ;;  %v1715_v30 = vld [vmem:[%s3999_s5 + $0x78] sm:$0xff] }
 0x61c   :  { %1524 = vmatprep.subr.mxu0 %v3389_v42  ;;  %2335 = vmatprep.subr.mxu1 %v4058_v36  ;;  %v1711_v50 = vld [vmem:[%s3999_s5 + $0x58] sm:$0xff] }
 0x61d   :  { %1525 = vmatpush1.msra.mxu0 %v3396_v40  ;;  %2336 = vmatpush3.msra.mxu1 %v3694_v56  ;;  %v1710_v56 = vld [vmem:[%s3999_s5 + $0x50] sm:$0xff] }
 0x61e   :  { %1526 = vmatprep.subr.mxu0 %v3403_v38  ;;  %2337 = vmatprep.subr.mxu1 %v4058_v36  ;;  %v4100_v38 = vld [vmem:[#allocation19_spill] sm:$0xff] }
 0x61f   :  { %1527 = vmatpush1.msra.mxu0 %v3410_v61  ;;  %2338 = vmatpush3.msra.mxu1 %v3703_v60  ;;  %v1709_v60 = vld [vmem:[%s3999_s5 + $0x48] sm:$0xff] }
 0x620   :  { %1528 = vmatprep.subr.mxu0 %v3417_v28  ;;  %2339 = vmatprep.subr.mxu1 %v4058_v36 }
 0x621   :  { %1529 = vmatpush1.msra.mxu0 %v3424_v46  ;;  %2340 = vmatpush3.msra.mxu1 %v3712_v62  ;;  %v1708_v62 = vld [vmem:[%s3999_s5 + $0x40] sm:$0xff] }
 0x622   :  { %1530 = vmatprep.subr.mxu0 %v3431_v44  ;;  %2341 = vmatprep.subr.mxu1 %v4058_v36 }
 0x623   :  { %1531 = vmatpush1.msra.mxu0 %v3438_v63  ;;  %2342 = vmatpush3.msra.mxu1 %v3721_v0  ;;  %v4101_v63 = vld [vmem:[#allocation20_spill] sm:$0xff]  ;;  %v1707_v0 = vld [vmem:[%s3999_s5 + $0x38] sm:$0xff] }
 0x624   :  { %1532 = vmatprep.subr.mxu0 %v3445_v34  ;;  %2343 = vmatprep.subr.mxu1 %v4058_v36 }
 0x625   :  { %1533 = vmatpush1.msra.mxu0 %v3452_v26  ;;  %2344 = vmatpush3.msra.mxu1 %v3730_v1  ;;  %v1706_v1 = vld [vmem:[%s3999_s5 + $0x30] sm:$0xff] }
 0x626   :  { %1534 = vmatprep.subr.mxu0 %v3459_v16  ;;  %2345 = vmatprep.subr.mxu1 %v4058_v36 }
 0x627   :  { %1535 = vmatpush1.msra.mxu0 %v3466_v2  ;;  %2346 = vmatpush3.msra.mxu1 %v3739_v5  ;;  %v1705_v5 = vld [vmem:[%s3999_s5 + $0x28] sm:$0xff] }
 0x628   :  { %1536 = vmatprep.subr.mxu0 %v3473_v32  ;;  %2347 = vmatprep.subr.mxu1 %v4058_v36 }
 0x629   :  { %1537 = vmatpush1.msra.mxu0 %v3480_v8  ;;  %2348 = vmatpush3.msra.mxu1 %v3748_v7  ;;  %v3901_v8 = vld [vmem:[%s3998_s4] ss:$0 sm:$0xff] }
 0x62a   :  { %1538 = vmatprep.subr.mxu0 %v3487_v10  ;;  %2349 = vmatprep.subr.mxu1 %v4058_v36  ;;  %v1704_v7 = vld [vmem:[%s3999_s5 + $0x20] sm:$0xff] }
 0x62b   :  { %1539 = vmatpush1.msra.mxu0 %v3494_v15  ;;  %2350 = vmatpush3.msra.mxu1 %v3757_v9  ;;  %v1703_v9 = vld [vmem:[%s3999_s5 + $0x18] sm:$0xff] }
 0x62c   :  { %1540 = vmatprep.subr.mxu0 %v3501_v17  ;;  %2351 = vmatprep.subr.mxu1 %v4058_v36 }
 0x62d   :  { %1541 = vmatpush1.msra.mxu0 %v3508_v19  ;;  %2352 = vmatpush3.msra.mxu1 %v3766_v12  ;;  %v4102_v19 = vld [vmem:[#allocation28_spill] sm:$0xff]  ;;  %v1702_v12 = vld [vmem:[%s3999_s5 + $0x10] sm:$0xff] }
 0x62e   :  { %1542 = vmatprep.subr.mxu0 %v3515_v21  ;;  %2353 = vmatprep.subr.mxu1 %v4058_v36 }
 0x62f   :  { %1543 = vmatpush1.msra.mxu0 %v3522_v23  ;;  %2354 = vmatpush3.msra.mxu1 %v3775_v14  ;;  %v1701_v14 = vld [vmem:[%s3999_s5 + $0x8] sm:$0xff] }
 0x630   :  { %1544 = vmatprep.subr.mxu0 %v3529_v25  ;;  %2355 = vmatprep.subr.mxu1 %v4058_v36 }
 0x631   :  { %1545 = vmatpush1.msra.mxu0 %v3536_v27  ;;  %2356 = vmatpush3.msra.mxu1 %v3784_v4  ;;  %v1700_v4 = vld [vmem:[%s3999_s5] sm:$0xff] }
 0x632   :  { %1546 = vmatprep.subr.mxu0 %v3543_v29  ;;  %2357 = vmatprep.subr.mxu1 %v4058_v36 }
 0x633   :  { %1547 = vmatpush1.msra.mxu0 %v3550_v31  ;;  %2358 = vmatpush3.msra.mxu1 %v3793_v24  ;;  %v4104_v24 = vld [vmem:[#allocation4_spill] sm:$0xff] }
 0x634   :  { %1548 = vmatprep.subr.mxu0 %v3557_v33  ;;  %2359 = vmatprep.subr.mxu1 %v4058_v36  ;;  %v1693_v6 = vmax.f32 %v4104_v24, 0.0 }
 0x635   :  { %1549 = vmatpush1.msra.mxu0 %v3564_v35  ;;  %2360 = vmatpush3.msra.mxu1 %v4096_v3  ;;  %v1714_v35 = vld [vmem:[%s3999_s5 + $0x70] sm:$0xff] }
 0x636   :  { %1550 = vmatprep.subr.mxu0 %v4097_v48  ;;  %2361 = vmatprep.subr.mxu1 %v4058_v36 }
 0x637   :  { %1551 = vmatpush1.msra.mxu0 %v4098_v22  ;;  %1584 = vmatprep.mubr.f32.mxu0 %v4058_v36  ;;  %v4108_v22 = vld [vmem:[#allocation22_spill] sm:$0xff] }
 0x638   :  { %2362 = vmatpush3.msra.mxu1 %v4099_v20  ;;  %2363 = vmatprep.mubr.msk.f32.mxu1 %vm2542_vm0, %v4058_v36 }
 0x639   :  { %2366 = vmatprep.subr.mxu0 %v1715_v30 }
 0x6d8   :  { %v1422_v42 = vpop.f32.mrf.mxu0  ;;  %v1493_v40 = vpop.f32.mrf.mxu1 }
 0x6d9   :  { %v1497_v61 = vadd.f32 %v1422_v42, %v4100_v38  ;;  %v1511_v10 = vadd.f32 %v3901_v8, %v1493_v40  ;;  %v1857_v40 = vld [vmem:[%s4000_s6] ss:$0 sm:$0xff] }
 0x6da   :  { %v2330_v28 = vpop.f32.mrf.mxu1  ;;  %v1424_v44 = vpop.f32.mrf.mxu0 }
 0x6db   :  { %v1853_v46 = vmul.f32 -1.442695, %v1497_v61  ;;  %v1504_v34 = vadd.f32 %v1424_v44, %v4101_v63 }
 0x6dd   :  { %2472 = vpow2.f32 %v1853_v46  ;;  %v1854_v26 = vmul.f32 -1.442695, %v1504_v34 }
 0x6df   :  { %2474 = vpow2.f32 %v1854_v26 }
 0x6ea   :  { %v2473_v16 = vpop.eup %2472 }
 0x6eb   :  { %v1501_v2 = vadd.f32 1.0, %v2473_v16 }
 0x6ec   :  { %v2475_v36 = vpop.eup %2474 }
 0x6ed   :  { %2476 = vrcp.f32 %v1501_v2  ;;  %v1508_v32 = vadd.f32 1.0, %v2475_v36  ;;  %v4109_v2 = vld [vmem:[#allocation27_spill] sm:$0xff] }
 0x6ef   :  { %2478 = vrcp.f32 %v1508_v32 }
 0x6fa   :  { %v2477_v15 = vpop.eup %2476 }
 0x6fb   :  { %v1512_v17 = vmul.f32 %v2477_v15, %v1511_v10 }
 0x6fc   :  { %v2479_v23 = vpop.eup %2478 }
 0x6fd   :  { %v1513_v21 = vadd.f32 %v1512_v17, %v4102_v19  ;;  %v1515_v25 = vsub.f32 1.0, %v2479_v23  ;;  %v1517_v31 = vmul.f32 %v2479_v23, %v3824_v41 }
 0x6ff   :  { %2480 = vtanh.f32 %v1513_v21 }
 0x70c   :  { %v2481_v27 = vpop.eup %2480 }
 0x70d   :  { %v1516_v29 = vmul.f32 %v2481_v27, %v1515_v25 }
 0x70f   :  { %v3906_v33 = vadd.f32 %v1517_v31, %v1516_v29 }
 0x711   :  { %1585 = vmatmul.mubr.f32.vlgmr.msra.gmra.mxu0 %v3906_v33  ;;  %2364 = vmatmul.mubr.f32.vlgmr.msra.gmra.mxu1 %v3906_v33  ;;  %v1698_v13 = vmax.f32 %v3906_v33, 0.0 }
 0x712   :  { %2367 = vmatpush3.msra.mxu0 %v1715_v30  ;;  %2398 = vmatprep.mubr.f32.mxu0 %v1692_v52 }
 0x713   :  { %2368 = vmatprep.subr.mxu0 %v1714_v35 }
 0x714   :  { %2369 = vmatpush3.msra.mxu0 %v1714_v35 }
 0x715   :  { %2370 = vmatprep.subr.mxu0 %v1713_v54 }
 0x716   :  { %2371 = vmatpush3.msra.mxu0 %v1713_v54 }
 0x717   :  { %2372 = vmatprep.subr.mxu0 %v1712_v53 }
 0x718   :  { %2373 = vmatpush3.msra.mxu0 %v1712_v53 }
 0x719   :  { %2374 = vmatprep.subr.mxu0 %v1711_v50 }
 0x71a   :  { %2375 = vmatpush3.msra.mxu0 %v1711_v50 }
 0x71b   :  { %2376 = vmatprep.subr.mxu0 %v1710_v56 }
 0x71c   :  { %2377 = vmatpush3.msra.mxu0 %v1710_v56 }
 0x71d   :  { %2378 = vmatprep.subr.mxu0 %v1709_v60 }
 0x71e   :  { %2379 = vmatpush3.msra.mxu0 %v1709_v60 }
 0x71f   :  { %2380 = vmatprep.subr.mxu0 %v1708_v62 }
 0x720   :  { %2381 = vmatpush3.msra.mxu0 %v1708_v62 }
 0x721   :  { %2382 = vmatprep.subr.mxu0 %v1707_v0 }
 0x722   :  { %2383 = vmatpush3.msra.mxu0 %v1707_v0 }
 0x723   :  { %2384 = vmatprep.subr.mxu0 %v1706_v1 }
 0x724   :  { %2385 = vmatpush3.msra.mxu0 %v1706_v1 }
 0x725   :  { %2386 = vmatprep.subr.mxu0 %v1705_v5 }
 0x726   :  { %2387 = vmatpush3.msra.mxu0 %v1705_v5 }
 0x727   :  { %2388 = vmatprep.subr.mxu0 %v1704_v7 }
 0x728   :  { %2389 = vmatpush3.msra.mxu0 %v1704_v7 }
 0x729   :  { %2390 = vmatprep.subr.mxu0 %v1703_v9 }
 0x72a   :  { %2391 = vmatpush3.msra.mxu0 %v1703_v9 }
 0x72b   :  { %2392 = vmatprep.subr.mxu0 %v1702_v12 }
 0x72c   :  { %2393 = vmatpush3.msra.mxu0 %v1702_v12 }
 0x72d   :  { %2394 = vmatprep.subr.mxu0 %v1701_v14 }
 0x72e   :  { %2395 = vmatpush3.msra.mxu0 %v1701_v14 }
 0x72f   :  { %2396 = vmatprep.subr.mxu0 %v1700_v4 }
 0x730   :  { %2397 = vmatpush3.msra.mxu0 %v1700_v4 }
 0x731   :  { %2399 = vmatmul.mubr.f32.vlgmr.msra.gmra.mxu0 %v1693_v6 }
 0x732   :  { %2401 = vmatprep.mubr.f32.mxu0 %v1694_v37 }
 0x735   :  { %2402 = vmatmul.mubr.f32.gmra.mxu0 %v1695_v47 }
 0x736   :  { %2404 = vmatprep.mubr.f32.mxu0 %v1696_v49 }
 0x739   :  { %2405 = vmatmul.mubr.f32.gmra.mxu0 %v1697_v58 }
 0x73a   :  { %2407 = vmatprep.mubr.f32.mxu0 %v1698_v13 }
 0x7d1   :  { %v1586_v39 = vpop.f32.mrf.mxu0  ;;  %v1657_v43 = vpop.f32.mrf.mxu1 }
 0x7d2   :  { %v1661_v59 = vadd.f32 %v1586_v39, %v4107_v57  ;;  %v1675_v28 = vadd.f32 %v3901_v8, %v1657_v43 }
 0x7d3   :  { %v2365_v18 = vpop.f32.mrf.mxu1  ;;  %v1588_v48 = vpop.f32.mrf.mxu0 }
 0x7d4   :  { %v1855_v3 = vmul.f32 -1.442695, %v1661_v59  ;;  %v1668_v20 = vadd.f32 %v1588_v48, %v4108_v22 }
 0x7d6   :  { %2482 = vpow2.f32 %v1855_v3  ;;  %v1856_v30 = vmul.f32 -1.442695, %v1668_v20 }
 0x7d8   :  { %2484 = vpow2.f32 %v1856_v30 }
 0x7e3   :  { %v2483_v51 = vpop.eup %2482 }
 0x7e4   :  { %v1665_v42 = vadd.f32 1.0, %v2483_v51 }
 0x7e5   :  { %v2485_v41 = vpop.eup %2484 }
 0x7e6   :  { %2486 = vrcp.f32 %v1665_v42  ;;  %v1672_v38 = vadd.f32 1.0, %v2485_v41 }
 0x7e8   :  { %2488 = vrcp.f32 %v1672_v38 }
 0x7f1   :  { %v2400_v61 = vpop.f32.mrf.mxu0 }
 0x7f2   :  { %v1795_v46 = vadd.f32 %v2400_v61, %v1857_v40 }
 0x7f3   :  { %v2487_v44 = vpop.eup %2486  ;;  %v1789_v63 = vpop.f32.mrf.mxu0 }
 0x7f4   :  { %v1676_v34 = vmul.f32 %v2487_v44, %v1675_v28  ;;  %1829 = vst [vmem:[%s4001_s7 + $0x8] sm:$0xff] %v1795_v46  ;;  %v1790_v26 = vadd.f32 %v1857_v40, %v1789_v63 }
 0x7f5   :  { %v2403_v16 = vpop.f32.mrf.mxu0  ;;  %v2489_v23 = vpop.eup %2488 }
 0x7f6   :  { %v1677_v36 = vadd.f32 %v1676_v34, %v4109_v2  ;;  %1828 = vst [vmem:[%s4001_s7] sm:$0xff] %v1790_v26  ;;  %v1805_v32 = vadd.f32 %v2403_v16, %v1857_v40  ;;  %v1679_v25 = vsub.f32 1.0, %v2489_v23  ;;  %v1681_v31 = vmul.f32 %v2489_v23, %v3906_v33 }
 0x7f7   :  { %v1799_v10 = vpop.f32.mrf.mxu0 }
 0x7f8   :  { %2490 = vtanh.f32 %v1677_v36  ;;  %1831 = vst [vmem:[%s4001_s7 + $0x18] sm:$0xff] %v1805_v32  ;;  %v1800_v8 = vadd.f32 %v1857_v40, %v1799_v10 }
 0x7f9   :  { %v2406_v15 = vpop.f32.mrf.mxu0 }
 0x7fa   :  { %1830 = vst [vmem:[%s4001_s7 + $0x10] sm:$0xff] %v1800_v8  ;;  %v1815_v17 = vadd.f32 %v2406_v15, %v1857_v40 }
 0x7fb   :  { %v1809_v19 = vpop.f32.mrf.mxu0 }
 0x7fc   :  { %1833 = vst [vmem:[%s4001_s7 + $0x28] sm:$0xff] %v1815_v17  ;;  %v1810_v21 = vadd.f32 %v1857_v40, %v1809_v19 }
 0x7fe   :  { %1832 = vst [vmem:[%s4001_s7 + $0x20] sm:$0xff] %v1810_v21 }
 0x805   :  { %v2491_v27 = vpop.eup %2490 }
 0x806   :  { %v1680_v29 = vmul.f32 %v2491_v27, %v1679_v25 }
 0x808   :  { %v1682_v35 = vadd.f32 %v1681_v31, %v1680_v29 }
 0x80a   :  { %v1699_v55 = vmax.f32 %v1682_v35, 0.0 }
 0x80c   :  { %2408 = vmatmul.mubr.f32.gmra.mxu0 %v1699_v55 }
 0x8cc   :  { %v2409_v52 = vpop.f32.mrf.mxu0 }
 0x8cd   :  { %v1825_v54 = vadd.f32 %v2409_v52, %v1857_v40 }
 0x8ce   :  { %v1819_v53 = vpop.f32.mrf.mxu0 }
 0x8cf   :  { %1835 = vst [vmem:[%s4001_s7 + $0x38] sm:$0xff] %v1825_v54  ;;  %v1820_v50 = vadd.f32 %v1857_v40, %v1819_v53 }
 0x8d1   :  { %1834 = vst [vmem:[%s4001_s7 + $0x30] sm:$0xff] %v1820_v50 }

</bundles_post_ra>
